<compile_context>
chip_gen: v7x
topology: tpu7x:2x2x1
jax: 0.10.0
libtpu: 0.0.40
codegen_flags: <defaults>
</compile_context>

<pallas_src>
import functools

import numpy as np
import jax
import jax.numpy as jnp
from jax import lax
from jax.experimental import pallas as pl
from jax.experimental.pallas import tpu as pltpu


# ---------------------------------------------------------------------------------------------
# Fused kernel: 2x2 max-pool + valid conv (K-folded matmul) + bias + LeakyReLU for one row tile.
# ---------------------------------------------------------------------------------------------
def _down_kernel(x_ref, w_ref, b_ref, o_ref, pool_ref, *, kh, kw, cin, th, neg_slope):
    # x_ref   : (1, Hp, 2, Wp, 2*cin)  full pooled-row view of one batch*depth slice (bf16)
    # w_ref   : (kh*kw*cin, Cout)      im2col-ordered weights (bf16)
    # b_ref   : (1, Cout)              bias (f32)
    # o_ref   : (1, th, Wo, Cout)      one tile of output rows
    # pool_ref: (th+kh-1, Wp, cin)     VMEM scratch: pooled rows needed by this tile
    t = pl.program_id(1)
    wo = o_ref.shape[2]
    cout = o_ref.shape[3]
    nrows = th + kh - 1
    row0 = t * th                       # first pooled row needed by this tile

    # ---- fused MaxPool3d((1,2,2)) on exactly the rows this tile needs -----------------------
    top = x_ref[0, pl.ds(row0, nrows), 0]            # (nrows, Wp, 2*cin)
    bot = x_ref[0, pl.ds(row0, nrows), 1]
    hmax = jnp.maximum(top, bot)                     # max over the H pair
    pool_ref[...] = jnp.maximum(hmax[:, :, :cin], hmax[:, :, cin:])   # max over the W pair

    w = w_ref[...]
    bias = jnp.broadcast_to(b_ref[...], (wo, cout))  # hoisted out of the row loop (f32)

    # ---- valid conv: one K-folded matmul per output row (statically unrolled) ---------------
    for i in range(th):
        taps = [pool_ref[i + dh, pl.ds(dw, wo), :]   # (wo, cin) per tap
                for dh in range(kh) for dw in range(kw)]
        patch = jnp.concatenate(taps, axis=-1)       # (wo, kh*kw*cin)  im2col row
        acc = jnp.dot(patch, w, preferred_element_type=jnp.float32) + bias
        acc = jnp.where(acc >= 0, acc, neg_slope * acc)   # LeakyReLU(0.01)
        o_ref[0, i] = acc.astype(o_ref.dtype)


def _pick_row_tile(ho, cap):
    for t in range(min(cap, ho), 0, -1):
        if ho % t == 0:
            return t
    return ho


def unet_down(x, w, b, *, negative_slope=0.01, row_tile=8,
              compute_dtype=jnp.bfloat16, out_dtype=jnp.float32):
    """PyTorch _unet_down forward (default args: MaxPool3d((1,2,2),(1,2,2)) ->
    Conv3d(Cin, Cout, (1,kh,kw), stride 1, padding 0) -> LeakyReLU(0.01)).

    x: (B, Cin, D, H, W)   NCDHW, like the PyTorch module
    w: (Cout, Cin, 1, kh, kw)  PyTorch Conv3d weight (depth kernel must be 1)
    b: (Cout,)
    returns: (B, Cout, D, Ho, Wo) with Ho = H//2 - kh + 1, Wo = W//2 - kw + 1
    """
    # TODO(synk): batch_norm=True branch (BatchNorm3d) is not implemented.
    # TODO(synk): only the default maxpool3d kernel/stride (1,2,2)/(1,2,2), padding 0 is supported.
    B, Cin, D, H, W = x.shape
    Cout, Cin_w, kd, kh, kw = w.shape
    assert Cin_w == Cin and kd == 1, "depth kernel must be 1"
    Hp, Wp = H // 2, W // 2
    Ho, Wo = Hp - kh + 1, Wp - kw + 1
    assert Ho >= 1 and Wo >= 1
    N = B * D

    # NCDHW -> channels-last with depth folded into batch (one layout pass of glue).
    xc = jnp.transpose(x, (0, 2, 3, 4, 1)).reshape(N, H, W, Cin)
    xc = xc[:, :2 * Hp, :2 * Wp, :]                          # floor-mode pooling crop
    # Free regrouping: (N, 2Hp, 2Wp, C) == (N, Hp, 2, Wp, 2C) in row-major memory, so both
    # pooling maxima become plain contiguous slices inside the kernel.
    x5 = xc.reshape(N, Hp, 2, Wp, 2 * Cin).astype(compute_dtype)

    # im2col-ordered weights: row index = (dh*kw + dw)*Cin + ci, column = cout.
    w2 = jnp.transpose(w[:, :, 0, :, :], (2, 3, 1, 0)).reshape(kh * kw * Cin, Cout)
    w2 = w2.astype(compute_dtype)
    b2 = b.reshape(1, Cout).astype(jnp.float32)

    th = _pick_row_tile(Ho, row_tile)
    kern = functools.partial(_down_kernel, kh=kh, kw=kw, cin=Cin, th=th,
                             neg_slope=negative_slope)

    out = pl.pallas_call(
        kern,
        out_shape=jax.ShapeDtypeStruct((N, Ho, Wo, Cout), out_dtype),
        grid=(N, Ho // th),
        in_specs=[
            # Full image per batch*depth slice; block index ignores the row-tile axis so the
            # DMA is issued once per slice and skipped for the remaining row tiles.
            pl.BlockSpec((1, Hp, 2, Wp, 2 * Cin), lambda n, t: (n, 0, 0, 0, 0)),
            pl.BlockSpec((kh * kw * Cin, Cout), lambda n, t: (0, 0)),
            pl.BlockSpec((1, Cout), lambda n, t: (0, 0)),
        ],
        out_specs=pl.BlockSpec((1, th, Wo, Cout), lambda n, t: (n, t, 0, 0)),
        scratch_shapes=[pltpu.VMEM((th + kh - 1, Wp, Cin), compute_dtype)],
        compiler_params=pltpu.CompilerParams(
            dimension_semantics=("parallel", "parallel"),
            vmem_limit_bytes=32 * 1024 * 1024),
    )(x5, w2, b2)

    # back to NCDHW
    return out.reshape(B, D, Ho, Wo, Cout).transpose(0, 4, 1, 2, 3)


# ---------------------------------------------------------------------------------------------
# Pure-JAX reference (for correctness check).
# ---------------------------------------------------------------------------------------------
def unet_down_reference(x, w, b, *, negative_slope=0.01):
    B, Cin, D, H, W = x.shape
    Cout = w.shape[0]
    xp = lax.reduce_window(x, -jnp.inf, lax.max,
                           (1, 1, 1, 2, 2), (1, 1, 1, 2, 2), 'VALID')
    Hp, Wp = xp.shape[3], xp.shape[4]
    x2 = xp.transpose(0, 2, 1, 3, 4).reshape(B * D, Cin, Hp, Wp)
    y = lax.conv_general_dilated(
        x2, w[:, :, 0, :, :], window_strides=(1, 1), padding='VALID',
        dimension_numbers=('NCHW', 'OIHW', 'NCHW'),
        precision=lax.Precision.HIGHEST)
    y = y + b.reshape(1, Cout, 1, 1)
    y = jnp.where(y >= 0, y, negative_slope * y)
    Ho, Wo = y.shape[2], y.shape[3]
    return y.reshape(B, D, Cout, Ho, Wo).transpose(0, 2, 1, 3, 4)


if __name__ == "__main__":
    # Small shapes consistent with the module: NCDHW input, PyTorch-style Conv3d params.
    B, Cin, D, H, W = 2, 16, 3, 32, 32
    Cout, kh, kw = 32, 3, 3

    key = jax.random.PRNGKey(0)
    kx, kwgt, kb = jax.random.split(key, 3)
    x = jax.random.normal(kx, (B, Cin, D, H, W), dtype=jnp.float32)
    bound = 1.0 / np.sqrt(Cin * kh * kw)
    w = jax.random.uniform(kwgt, (Cout, Cin, 1, kh, kw), jnp.float32, -bound, bound)
    b = jax.random.uniform(kb, (Cout,), jnp.float32, -bound, bound)

    out = unet_down(x, w, b)
    out = jax.block_until_ready(out)

    Ho, Wo = H // 2 - kh + 1, W // 2 - kw + 1
    assert out.shape == (B, Cout, D, Ho, Wo), out.shape

    # Correctness check vs. XLA reference (reference inputs quantized to bf16 to match the
    # kernel's compute dtype; accumulation is f32 in both).
    xq = x.astype(jnp.bfloat16).astype(jnp.float32)
    wq = w.astype(jnp.bfloat16).astype(jnp.float32)
    ref = unet_down_reference(xq, wq, b)
    err = float(jnp.max(jnp.abs(out - ref)))
    assert np.isfinite(err) and err < 5e-2, err

    print("KERNEL_OK")
</pallas_src>

<mosaic_0001>
module attributes {stable_mosaic.version = 11 : i64} {
  func.func @_down_kernel(%arg0: i32, %arg1: i32, %arg2: memref<1x16x2x16x32xbf16, #tpu.memory_space<vmem>>, %arg3: memref<144x32xbf16, #tpu.memory_space<vmem>>, %arg4: memref<1x32xf32, #tpu.memory_space<vmem>>, %arg5: memref<1x7x14x32xf32, #tpu.memory_space<vmem>>, %arg6: memref<9x16x16xbf16, #tpu.memory_space<vmem>>) attributes {dimension_semantics = [#tpu.dimension_semantics<parallel>, #tpu.dimension_semantics<parallel>], iteration_bounds = array<i64: 6, 2>, scalar_prefetch = 0 : i64, scratch_operands = 1 : i64, tpu.core_type = #tpu.core_type<tc>, window_params = [{transform_indices = @transform_0, window_bounds = array<i64: 1, 16, 2, 16, 32>}, {pipeline_mode = #tpu.pipeline_mode<synchronous>, transform_indices = @transform_1, window_bounds = array<i64: 144, 32>}, {pipeline_mode = #tpu.pipeline_mode<synchronous>, transform_indices = @transform_2, window_bounds = array<i64: 1, 32>}, {transform_indices = @transform_3, window_bounds = array<i64: 1, 7, 14, 32>}]} {
    %c7_i32 = arith.constant 7 : i32
    %0 = arith.muli %arg1, %c7_i32 : i32
    %c0 = arith.constant 0 : index
    %1 = arith.index_cast %0 : i32 to index
    %c0_0 = arith.constant 0 : index
    %c0_1 = arith.constant 0 : index
    %c0_2 = arith.constant 0 : index
    %2 = vector.load %arg2[%c0, %1, %c0_0, %c0_1, %c0_2] : memref<1x16x2x16x32xbf16, #tpu.memory_space<vmem>>, vector<1x9x1x16x32xbf16>
    %3 = vector.shape_cast %2 : vector<1x9x1x16x32xbf16> to vector<9x16x32xbf16>
    %c0_3 = arith.constant 0 : index
    %4 = arith.index_cast %0 : i32 to index
    %c1 = arith.constant 1 : index
    %c0_4 = arith.constant 0 : index
    %c0_5 = arith.constant 0 : index
    %5 = vector.load %arg2[%c0_3, %4, %c1, %c0_4, %c0_5] : memref<1x16x2x16x32xbf16, #tpu.memory_space<vmem>>, vector<1x9x1x16x32xbf16>
    %6 = vector.shape_cast %5 : vector<1x9x1x16x32xbf16> to vector<9x16x32xbf16>
    %7 = arith.maximumf %3, %6 : vector<9x16x32xbf16>
    %8 = vector.extract_strided_slice %7 {offsets = [0, 0, 0], sizes = [9, 16, 16], strides = [1, 1, 1]} : vector<9x16x32xbf16> to vector<9x16x16xbf16>
    %9 = vector.extract_strided_slice %7 {offsets = [0, 0, 16], sizes = [9, 16, 16], strides = [1, 1, 1]} : vector<9x16x32xbf16> to vector<9x16x16xbf16>
    %10 = arith.maximumf %8, %9 : vector<9x16x16xbf16>
    %c0_6 = arith.constant 0 : index
    %c0_7 = arith.constant 0 : index
    %c0_8 = arith.constant 0 : index
    %11 = vector.load %arg6[%c0_6, %c0_7, %c0_8] : memref<9x16x16xbf16, #tpu.memory_space<vmem>>, vector<9x16x16xbf16>
    tpu.vector_store %arg6[%c0_6, %c0_7, %c0_8], %10 {strides = array<i32>} : memref<9x16x16xbf16, #tpu.memory_space<vmem>>, vector<9x16x16xbf16>,
    %c0_9 = arith.constant 0 : index
    %c0_10 = arith.constant 0 : index
    %12 = vector.load %arg3[%c0_9, %c0_10] : memref<144x32xbf16, #tpu.memory_space<vmem>>, vector<144x32xbf16>
    %c0_11 = arith.constant 0 : index
    %c0_12 = arith.constant 0 : index
    %13 = vector.load %arg4[%c0_11, %c0_12] : memref<1x32xf32, #tpu.memory_space<vmem>>, vector<1x32xf32>
    %14 = vector.shape_cast %13 : vector<1x32xf32> to vector<1x32xf32>
    %15 = vector.broadcast %14 : vector<1x32xf32> to vector<14x32xf32>
    %c0_13 = arith.constant 0 : index
    %c0_14 = arith.constant 0 : index
    %c0_15 = arith.constant 0 : index
    %16 = vector.load %arg6[%c0_13, %c0_14, %c0_15] : memref<9x16x16xbf16, #tpu.memory_space<vmem>>, vector<1x14x16xbf16>
    %17 = vector.shape_cast %16 : vector<1x14x16xbf16> to vector<14x16xbf16>
    %c0_16 = arith.constant 0 : index
    %c1_17 = arith.constant 1 : index
    %c0_18 = arith.constant 0 : index
    %18 = vector.load %arg6[%c0_16, %c1_17, %c0_18] : memref<9x16x16xbf16, #tpu.memory_space<vmem>>, vector<1x14x16xbf16>
    %19 = vector.shape_cast %18 : vector<1x14x16xbf16> to vector<14x16xbf16>
    %c0_19 = arith.constant 0 : index
    %c2 = arith.constant 2 : index
    %c0_20 = arith.constant 0 : index
    %20 = vector.load %arg6[%c0_19, %c2, %c0_20] : memref<9x16x16xbf16, #tpu.memory_space<vmem>>, vector<1x14x16xbf16>
    %21 = vector.shape_cast %20 : vector<1x14x16xbf16> to vector<14x16xbf16>
    %c1_21 = arith.constant 1 : index
    %c0_22 = arith.constant 0 : index
    %c0_23 = arith.constant 0 : index
    %22 = vector.load %arg6[%c1_21, %c0_22, %c0_23] : memref<9x16x16xbf16, #tpu.memory_space<vmem>>, vector<1x14x16xbf16>
    %23 = vector.shape_cast %22 : vector<1x14x16xbf16> to vector<14x16xbf16>
    %c1_24 = arith.constant 1 : index
    %c1_25 = arith.constant 1 : index
    %c0_26 = arith.constant 0 : index
    %24 = vector.load %arg6[%c1_24, %c1_25, %c0_26] : memref<9x16x16xbf16, #tpu.memory_space<vmem>>, vector<1x14x16xbf16>
    %25 = vector.shape_cast %24 : vector<1x14x16xbf16> to vector<14x16xbf16>
    %c1_27 = arith.constant 1 : index
    %c2_28 = arith.constant 2 : index
    %c0_29 = arith.constant 0 : index
    %26 = vector.load %arg6[%c1_27, %c2_28, %c0_29] : memref<9x16x16xbf16, #tpu.memory_space<vmem>>, vector<1x14x16xbf16>
    %27 = vector.shape_cast %26 : vector<1x14x16xbf16> to vector<14x16xbf16>
    %c2_30 = arith.constant 2 : index
    %c0_31 = arith.constant 0 : index
    %c0_32 = arith.constant 0 : index
    %28 = vector.load %arg6[%c2_30, %c0_31, %c0_32] : memref<9x16x16xbf16, #tpu.memory_space<vmem>>, vector<1x14x16xbf16>
    %29 = vector.shape_cast %28 : vector<1x14x16xbf16> to vector<14x16xbf16>
    %c2_33 = arith.constant 2 : index
    %c1_34 = arith.constant 1 : index
    %c0_35 = arith.constant 0 : index
    %30 = vector.load %arg6[%c2_33, %c1_34, %c0_35] : memref<9x16x16xbf16, #tpu.memory_space<vmem>>, vector<1x14x16xbf16>
    %31 = vector.shape_cast %30 : vector<1x14x16xbf16> to vector<14x16xbf16>
    %c2_36 = arith.constant 2 : index
    %c2_37 = arith.constant 2 : index
    %c0_38 = arith.constant 0 : index
    %32 = vector.load %arg6[%c2_36, %c2_37, %c0_38] : memref<9x16x16xbf16, #tpu.memory_space<vmem>>, vector<1x14x16xbf16>
    %33 = vector.shape_cast %32 : vector<1x14x16xbf16> to vector<14x16xbf16>
    %34 = tpu.concatenate %17, %19, %21, %23, %25, %27, %29, %31, %33 in 1 : vector<14x16xbf16>, vector<14x16xbf16>, vector<14x16xbf16>, vector<14x16xbf16>, vector<14x16xbf16>, vector<14x16xbf16>, vector<14x16xbf16>, vector<14x16xbf16>, vector<14x16xbf16> -> vector<14x144xbf16>
    %cst = arith.constant dense<0.000000e+00> : vector<14x32xf32>
    %35 = tpu.matmul %34, %12, %cst {dimension_numbers = #tpu.dot_dimension_numbers<[1], [0], [0], [1], [0, 0, 1, 1], [], []>} : vector<14x144xbf16>, vector<144x32xbf16>, vector<14x32xf32> -> vector<14x32xf32>
    %36 = arith.addf %35, %15 : vector<14x32xf32>
    %cst_39 = arith.constant 0.000000e+00 : f32
    %37 = vector.broadcast %cst_39 : f32 to vector<14x32xf32>
    %38 = arith.cmpf oge, %36, %37 : vector<14x32xf32>
    %cst_40 = arith.constant 0.00999999977 : f32
    %39 = vector.broadcast %cst_40 : f32 to vector<14x32xf32>
    %40 = arith.mulf %39, %36 : vector<14x32xf32>
    %41 = arith.select %38, %36, %40 : vector<14x32xi1>, vector<14x32xf32>
    %c0_41 = arith.constant 0 : index
    %c0_42 = arith.constant 0 : index
    %c0_43 = arith.constant 0 : index
    %c0_44 = arith.constant 0 : index
    %42 = vector.load %arg5[%c0_41, %c0_42, %c0_43, %c0_44] : memref<1x7x14x32xf32, #tpu.memory_space<vmem>>, vector<1x1x14x32xf32>
    %43 = vector.shape_cast %42 : vector<1x1x14x32xf32> to vector<14x32xf32>
    %44 = vector.shape_cast %41 : vector<14x32xf32> to vector<1x1x14x32xf32>
    tpu.vector_store %arg5[%c0_41, %c0_42, %c0_43, %c0_44], %44 {strides = array<i32>} : memref<1x7x14x32xf32, #tpu.memory_space<vmem>>, vector<1x1x14x32xf32>,
    %c1_45 = arith.constant 1 : index
    %c0_46 = arith.constant 0 : index
    %c0_47 = arith.constant 0 : index
    %45 = vector.load %arg6[%c1_45, %c0_46, %c0_47] : memref<9x16x16xbf16, #tpu.memory_space<vmem>>, vector<1x14x16xbf16>
    %46 = vector.shape_cast %45 : vector<1x14x16xbf16> to vector<14x16xbf16>
    %c1_48 = arith.constant 1 : index
    %c1_49 = arith.constant 1 : index
    %c0_50 = arith.constant 0 : index
    %47 = vector.load %arg6[%c1_48, %c1_49, %c0_50] : memref<9x16x16xbf16, #tpu.memory_space<vmem>>, vector<1x14x16xbf16>
    %48 = vector.shape_cast %47 : vector<1x14x16xbf16> to vector<14x16xbf16>
    %c1_51 = arith.constant 1 : index
    %c2_52 = arith.constant 2 : index
    %c0_53 = arith.constant 0 : index
    %49 = vector.load %arg6[%c1_51, %c2_52, %c0_53] : memref<9x16x16xbf16, #tpu.memory_space<vmem>>, vector<1x14x16xbf16>
    %50 = vector.shape_cast %49 : vector<1x14x16xbf16> to vector<14x16xbf16>
    %c2_54 = arith.constant 2 : index
    %c0_55 = arith.constant 0 : index
    %c0_56 = arith.constant 0 : index
    %51 = vector.load %arg6[%c2_54, %c0_55, %c0_56] : memref<9x16x16xbf16, #tpu.memory_space<vmem>>, vector<1x14x16xbf16>
    %52 = vector.shape_cast %51 : vector<1x14x16xbf16> to vector<14x16xbf16>
    %c2_57 = arith.constant 2 : index
    %c1_58 = arith.constant 1 : index
    %c0_59 = arith.constant 0 : index
    %53 = vector.load %arg6[%c2_57, %c1_58, %c0_59] : memref<9x16x16xbf16, #tpu.memory_space<vmem>>, vector<1x14x16xbf16>
    %54 = vector.shape_cast %53 : vector<1x14x16xbf16> to vector<14x16xbf16>
    %c2_60 = arith.constant 2 : index
    %c2_61 = arith.constant 2 : index
    %c0_62 = arith.constant 0 : index
    %55 = vector.load %arg6[%c2_60, %c2_61, %c0_62] : memref<9x16x16xbf16, #tpu.memory_space<vmem>>, vector<1x14x16xbf16>
    %56 = vector.shape_cast %55 : vector<1x14x16xbf16> to vector<14x16xbf16>
    %c3 = arith.constant 3 : index
    %c0_63 = arith.constant 0 : index
    %c0_64 = arith.constant 0 : index
    %57 = vector.load %arg6[%c3, %c0_63, %c0_64] : memref<9x16x16xbf16, #tpu.memory_space<vmem>>, vector<1x14x16xbf16>
    %58 = vector.shape_cast %57 : vector<1x14x16xbf16> to vector<14x16xbf16>
    %c3_65 = arith.constant 3 : index
    %c1_66 = arith.constant 1 : index
    %c0_67 = arith.constant 0 : index
    %59 = vector.load %arg6[%c3_65, %c1_66, %c0_67] : memref<9x16x16xbf16, #tpu.memory_space<vmem>>, vector<1x14x16xbf16>
    %60 = vector.shape_cast %59 : vector<1x14x16xbf16> to vector<14x16xbf16>
    %c3_68 = arith.constant 3 : index
    %c2_69 = arith.constant 2 : index
    %c0_70 = arith.constant 0 : index
    %61 = vector.load %arg6[%c3_68, %c2_69, %c0_70] : memref<9x16x16xbf16, #tpu.memory_space<vmem>>, vector<1x14x16xbf16>
    %62 = vector.shape_cast %61 : vector<1x14x16xbf16> to vector<14x16xbf16>
    %63 = tpu.concatenate %46, %48, %50, %52, %54, %56, %58, %60, %62 in 1 : vector<14x16xbf16>, vector<14x16xbf16>, vector<14x16xbf16>, vector<14x16xbf16>, vector<14x16xbf16>, vector<14x16xbf16>, vector<14x16xbf16>, vector<14x16xbf16>, vector<14x16xbf16> -> vector<14x144xbf16>
    %cst_71 = arith.constant dense<0.000000e+00> : vector<14x32xf32>
    %64 = tpu.matmul %63, %12, %cst_71 {dimension_numbers = #tpu.dot_dimension_numbers<[1], [0], [0], [1], [0, 0, 1, 1], [], []>} : vector<14x144xbf16>, vector<144x32xbf16>, vector<14x32xf32> -> vector<14x32xf32>
    %65 = arith.addf %64, %15 : vector<14x32xf32>
    %cst_72 = arith.constant 0.000000e+00 : f32
    %66 = vector.broadcast %cst_72 : f32 to vector<14x32xf32>
    %67 = arith.cmpf oge, %65, %66 : vector<14x32xf32>
    %cst_73 = arith.constant 0.00999999977 : f32
    %68 = vector.broadcast %cst_73 : f32 to vector<14x32xf32>
    %69 = arith.mulf %68, %65 : vector<14x32xf32>
    %70 = arith.select %67, %65, %69 : vector<14x32xi1>, vector<14x32xf32>
    %c0_74 = arith.constant 0 : index
    %c1_75 = arith.constant 1 : index
    %c0_76 = arith.constant 0 : index
    %c0_77 = arith.constant 0 : index
    %71 = vector.load %arg5[%c0_74, %c1_75, %c0_76, %c0_77] : memref<1x7x14x32xf32, #tpu.memory_space<vmem>>, vector<1x1x14x32xf32>
    %72 = vector.shape_cast %71 : vector<1x1x14x32xf32> to vector<14x32xf32>
    %73 = vector.shape_cast %70 : vector<14x32xf32> to vector<1x1x14x32xf32>
    tpu.vector_store %arg5[%c0_74, %c1_75, %c0_76, %c0_77], %73 {strides = array<i32>} : memref<1x7x14x32xf32, #tpu.memory_space<vmem>>, vector<1x1x14x32xf32>,
    %c2_78 = arith.constant 2 : index
    %c0_79 = arith.constant 0 : index
    %c0_80 = arith.constant 0 : index
    %74 = vector.load %arg6[%c2_78, %c0_79, %c0_80] : memref<9x16x16xbf16, #tpu.memory_space<vmem>>, vector<1x14x16xbf16>
    %75 = vector.shape_cast %74 : vector<1x14x16xbf16> to vector<14x16xbf16>
    %c2_81 = arith.constant 2 : index
    %c1_82 = arith.constant 1 : index
    %c0_83 = arith.constant 0 : index
    %76 = vector.load %arg6[%c2_81, %c1_82, %c0_83] : memref<9x16x16xbf16, #tpu.memory_space<vmem>>, vector<1x14x16xbf16>
    %77 = vector.shape_cast %76 : vector<1x14x16xbf16> to vector<14x16xbf16>
    %c2_84 = arith.constant 2 : index
    %c2_85 = arith.constant 2 : index
    %c0_86 = arith.constant 0 : index
    %78 = vector.load %arg6[%c2_84, %c2_85, %c0_86] : memref<9x16x16xbf16, #tpu.memory_space<vmem>>, vector<1x14x16xbf16>
    %79 = vector.shape_cast %78 : vector<1x14x16xbf16> to vector<14x16xbf16>
    %c3_87 = arith.constant 3 : index
    %c0_88 = arith.constant 0 : index
    %c0_89 = arith.constant 0 : index
    %80 = vector.load %arg6[%c3_87, %c0_88, %c0_89] : memref<9x16x16xbf16, #tpu.memory_space<vmem>>, vector<1x14x16xbf16>
    %81 = vector.shape_cast %80 : vector<1x14x16xbf16> to vector<14x16xbf16>
    %c3_90 = arith.constant 3 : index
    %c1_91 = arith.constant 1 : index
    %c0_92 = arith.constant 0 : index
    %82 = vector.load %arg6[%c3_90, %c1_91, %c0_92] : memref<9x16x16xbf16, #tpu.memory_space<vmem>>, vector<1x14x16xbf16>
    %83 = vector.shape_cast %82 : vector<1x14x16xbf16> to vector<14x16xbf16>
    %c3_93 = arith.constant 3 : index
    %c2_94 = arith.constant 2 : index
    %c0_95 = arith.constant 0 : index
    %84 = vector.load %arg6[%c3_93, %c2_94, %c0_95] : memref<9x16x16xbf16, #tpu.memory_space<vmem>>, vector<1x14x16xbf16>
    %85 = vector.shape_cast %84 : vector<1x14x16xbf16> to vector<14x16xbf16>
    %c4 = arith.constant 4 : index
    %c0_96 = arith.constant 0 : index
    %c0_97 = arith.constant 0 : index
    %86 = vector.load %arg6[%c4, %c0_96, %c0_97] : memref<9x16x16xbf16, #tpu.memory_space<vmem>>, vector<1x14x16xbf16>
    %87 = vector.shape_cast %86 : vector<1x14x16xbf16> to vector<14x16xbf16>
    %c4_98 = arith.constant 4 : index
    %c1_99 = arith.constant 1 : index
    %c0_100 = arith.constant 0 : index
    %88 = vector.load %arg6[%c4_98, %c1_99, %c0_100] : memref<9x16x16xbf16, #tpu.memory_space<vmem>>, vector<1x14x16xbf16>
    %89 = vector.shape_cast %88 : vector<1x14x16xbf16> to vector<14x16xbf16>
    %c4_101 = arith.constant 4 : index
    %c2_102 = arith.constant 2 : index
    %c0_103 = arith.constant 0 : index
    %90 = vector.load %arg6[%c4_101, %c2_102, %c0_103] : memref<9x16x16xbf16, #tpu.memory_space<vmem>>, vector<1x14x16xbf16>
    %91 = vector.shape_cast %90 : vector<1x14x16xbf16> to vector<14x16xbf16>
    %92 = tpu.concatenate %75, %77, %79, %81, %83, %85, %87, %89, %91 in 1 : vector<14x16xbf16>, vector<14x16xbf16>, vector<14x16xbf16>, vector<14x16xbf16>, vector<14x16xbf16>, vector<14x16xbf16>, vector<14x16xbf16>, vector<14x16xbf16>, vector<14x16xbf16> -> vector<14x144xbf16>
    %cst_104 = arith.constant dense<0.000000e+00> : vector<14x32xf32>
    %93 = tpu.matmul %92, %12, %cst_104 {dimension_numbers = #tpu.dot_dimension_numbers<[1], [0], [0], [1], [0, 0, 1, 1], [], []>} : vector<14x144xbf16>, vector<144x32xbf16>, vector<14x32xf32> -> vector<14x32xf32>
    %94 = arith.addf %93, %15 : vector<14x32xf32>
    %cst_105 = arith.constant 0.000000e+00 : f32
    %95 = vector.broadcast %cst_105 : f32 to vector<14x32xf32>
    %96 = arith.cmpf oge, %94, %95 : vector<14x32xf32>
    %cst_106 = arith.constant 0.00999999977 : f32
    %97 = vector.broadcast %cst_106 : f32 to vector<14x32xf32>
    %98 = arith.mulf %97, %94 : vector<14x32xf32>
    %99 = arith.select %96, %94, %98 : vector<14x32xi1>, vector<14x32xf32>
    %c0_107 = arith.constant 0 : index
    %c2_108 = arith.constant 2 : index
    %c0_109 = arith.constant 0 : index
    %c0_110 = arith.constant 0 : index
    %100 = vector.load %arg5[%c0_107, %c2_108, %c0_109, %c0_110] : memref<1x7x14x32xf32, #tpu.memory_space<vmem>>, vector<1x1x14x32xf32>
    %101 = vector.shape_cast %100 : vector<1x1x14x32xf32> to vector<14x32xf32>
    %102 = vector.shape_cast %99 : vector<14x32xf32> to vector<1x1x14x32xf32>
    tpu.vector_store %arg5[%c0_107, %c2_108, %c0_109, %c0_110], %102 {strides = array<i32>} : memref<1x7x14x32xf32, #tpu.memory_space<vmem>>, vector<1x1x14x32xf32>,
    %c3_111 = arith.constant 3 : index
    %c0_112 = arith.constant 0 : index
    %c0_113 = arith.constant 0 : index
    %103 = vector.load %arg6[%c3_111, %c0_112, %c0_113] : memref<9x16x16xbf16, #tpu.memory_space<vmem>>, vector<1x14x16xbf16>
    %104 = vector.shape_cast %103 : vector<1x14x16xbf16> to vector<14x16xbf16>
    %c3_114 = arith.constant 3 : index
    %c1_115 = arith.constant 1 : index
    %c0_116 = arith.constant 0 : index
    %105 = vector.load %arg6[%c3_114, %c1_115, %c0_116] : memref<9x16x16xbf16, #tpu.memory_space<vmem>>, vector<1x14x16xbf16>
    %106 = vector.shape_cast %105 : vector<1x14x16xbf16> to vector<14x16xbf16>
    %c3_117 = arith.constant 3 : index
    %c2_118 = arith.constant 2 : index
    %c0_119 = arith.constant 0 : index
    %107 = vector.load %arg6[%c3_117, %c2_118, %c0_119] : memref<9x16x16xbf16, #tpu.memory_space<vmem>>, vector<1x14x16xbf16>
    %108 = vector.shape_cast %107 : vector<1x14x16xbf16> to vector<14x16xbf16>
    %c4_120 = arith.constant 4 : index
    %c0_121 = arith.constant 0 : index
    %c0_122 = arith.constant 0 : index
    %109 = vector.load %arg6[%c4_120, %c0_121, %c0_122] : memref<9x16x16xbf16, #tpu.memory_space<vmem>>, vector<1x14x16xbf16>
    %110 = vector.shape_cast %109 : vector<1x14x16xbf16> to vector<14x16xbf16>
    %c4_123 = arith.constant 4 : index
    %c1_124 = arith.constant 1 : index
    %c0_125 = arith.constant 0 : index
    %111 = vector.load %arg6[%c4_123, %c1_124, %c0_125] : memref<9x16x16xbf16, #tpu.memory_space<vmem>>, vector<1x14x16xbf16>
    %112 = vector.shape_cast %111 : vector<1x14x16xbf16> to vector<14x16xbf16>
    %c4_126 = arith.constant 4 : index
    %c2_127 = arith.constant 2 : index
    %c0_128 = arith.constant 0 : index
    %113 = vector.load %arg6[%c4_126, %c2_127, %c0_128] : memref<9x16x16xbf16, #tpu.memory_space<vmem>>, vector<1x14x16xbf16>
    %114 = vector.shape_cast %113 : vector<1x14x16xbf16> to vector<14x16xbf16>
    %c5 = arith.constant 5 : index
    %c0_129 = arith.constant 0 : index
    %c0_130 = arith.constant 0 : index
    %115 = vector.load %arg6[%c5, %c0_129, %c0_130] : memref<9x16x16xbf16, #tpu.memory_space<vmem>>, vector<1x14x16xbf16>
    %116 = vector.shape_cast %115 : vector<1x14x16xbf16> to vector<14x16xbf16>
    %c5_131 = arith.constant 5 : index
    %c1_132 = arith.constant 1 : index
    %c0_133 = arith.constant 0 : index
    %117 = vector.load %arg6[%c5_131, %c1_132, %c0_133] : memref<9x16x16xbf16, #tpu.memory_space<vmem>>, vector<1x14x16xbf16>
    %118 = vector.shape_cast %117 : vector<1x14x16xbf16> to vector<14x16xbf16>
    %c5_134 = arith.constant 5 : index
    %c2_135 = arith.constant 2 : index
    %c0_136 = arith.constant 0 : index
    %119 = vector.load %arg6[%c5_134, %c2_135, %c0_136] : memref<9x16x16xbf16, #tpu.memory_space<vmem>>, vector<1x14x16xbf16>
    %120 = vector.shape_cast %119 : vector<1x14x16xbf16> to vector<14x16xbf16>
    %121 = tpu.concatenate %104, %106, %108, %110, %112, %114, %116, %118, %120 in 1 : vector<14x16xbf16>, vector<14x16xbf16>, vector<14x16xbf16>, vector<14x16xbf16>, vector<14x16xbf16>, vector<14x16xbf16>, vector<14x16xbf16>, vector<14x16xbf16>, vector<14x16xbf16> -> vector<14x144xbf16>
    %cst_137 = arith.constant dense<0.000000e+00> : vector<14x32xf32>
    %122 = tpu.matmul %121, %12, %cst_137 {dimension_numbers = #tpu.dot_dimension_numbers<[1], [0], [0], [1], [0, 0, 1, 1], [], []>} : vector<14x144xbf16>, vector<144x32xbf16>, vector<14x32xf32> -> vector<14x32xf32>
    %123 = arith.addf %122, %15 : vector<14x32xf32>
    %cst_138 = arith.constant 0.000000e+00 : f32
    %124 = vector.broadcast %cst_138 : f32 to vector<14x32xf32>
    %125 = arith.cmpf oge, %123, %124 : vector<14x32xf32>
    %cst_139 = arith.constant 0.00999999977 : f32
    %126 = vector.broadcast %cst_139 : f32 to vector<14x32xf32>
    %127 = arith.mulf %126, %123 : vector<14x32xf32>
    %128 = arith.select %125, %123, %127 : vector<14x32xi1>, vector<14x32xf32>
    %c0_140 = arith.constant 0 : index
    %c3_141 = arith.constant 3 : index
    %c0_142 = arith.constant 0 : index
    %c0_143 = arith.constant 0 : index
    %129 = vector.load %arg5[%c0_140, %c3_141, %c0_142, %c0_143] : memref<1x7x14x32xf32, #tpu.memory_space<vmem>>, vector<1x1x14x32xf32>
    %130 = vector.shape_cast %129 : vector<1x1x14x32xf32> to vector<14x32xf32>
    %131 = vector.shape_cast %128 : vector<14x32xf32> to vector<1x1x14x32xf32>
    tpu.vector_store %arg5[%c0_140, %c3_141, %c0_142, %c0_143], %131 {strides = array<i32>} : memref<1x7x14x32xf32, #tpu.memory_space<vmem>>, vector<1x1x14x32xf32>,
    %c4_144 = arith.constant 4 : index
    %c0_145 = arith.constant 0 : index
    %c0_146 = arith.constant 0 : index
    %132 = vector.load %arg6[%c4_144, %c0_145, %c0_146] : memref<9x16x16xbf16, #tpu.memory_space<vmem>>, vector<1x14x16xbf16>
    %133 = vector.shape_cast %132 : vector<1x14x16xbf16> to vector<14x16xbf16>
    %c4_147 = arith.constant 4 : index
    %c1_148 = arith.constant 1 : index
    %c0_149 = arith.constant 0 : index
    %134 = vector.load %arg6[%c4_147, %c1_148, %c0_149] : memref<9x16x16xbf16, #tpu.memory_space<vmem>>, vector<1x14x16xbf16>
    %135 = vector.shape_cast %134 : vector<1x14x16xbf16> to vector<14x16xbf16>
    %c4_150 = arith.constant 4 : index
    %c2_151 = arith.constant 2 : index
    %c0_152 = arith.constant 0 : index
    %136 = vector.load %arg6[%c4_150, %c2_151, %c0_152] : memref<9x16x16xbf16, #tpu.memory_space<vmem>>, vector<1x14x16xbf16>
    %137 = vector.shape_cast %136 : vector<1x14x16xbf16> to vector<14x16xbf16>
    %c5_153 = arith.constant 5 : index
    %c0_154 = arith.constant 0 : index
    %c0_155 = arith.constant 0 : index
    %138 = vector.load %arg6[%c5_153, %c0_154, %c0_155] : memref<9x16x16xbf16, #tpu.memory_space<vmem>>, vector<1x14x16xbf16>
    %139 = vector.shape_cast %138 : vector<1x14x16xbf16> to vector<14x16xbf16>
    %c5_156 = arith.constant 5 : index
    %c1_157 = arith.constant 1 : index
    %c0_158 = arith.constant 0 : index
    %140 = vector.load %arg6[%c5_156, %c1_157, %c0_158] : memref<9x16x16xbf16, #tpu.memory_space<vmem>>, vector<1x14x16xbf16>
    %141 = vector.shape_cast %140 : vector<1x14x16xbf16> to vector<14x16xbf16>
    %c5_159 = arith.constant 5 : index
    %c2_160 = arith.constant 2 : index
    %c0_161 = arith.constant 0 : index
    %142 = vector.load %arg6[%c5_159, %c2_160, %c0_161] : memref<9x16x16xbf16, #tpu.memory_space<vmem>>, vector<1x14x16xbf16>
    %143 = vector.shape_cast %142 : vector<1x14x16xbf16> to vector<14x16xbf16>
    %c6 = arith.constant 6 : index
    %c0_162 = arith.constant 0 : index
    %c0_163 = arith.constant 0 : index
    %144 = vector.load %arg6[%c6, %c0_162, %c0_163] : memref<9x16x16xbf16, #tpu.memory_space<vmem>>, vector<1x14x16xbf16>
    %145 = vector.shape_cast %144 : vector<1x14x16xbf16> to vector<14x16xbf16>
    %c6_164 = arith.constant 6 : index
    %c1_165 = arith.constant 1 : index
    %c0_166 = arith.constant 0 : index
    %146 = vector.load %arg6[%c6_164, %c1_165, %c0_166] : memref<9x16x16xbf16, #tpu.memory_space<vmem>>, vector<1x14x16xbf16>
    %147 = vector.shape_cast %146 : vector<1x14x16xbf16> to vector<14x16xbf16>
    %c6_167 = arith.constant 6 : index
    %c2_168 = arith.constant 2 : index
    %c0_169 = arith.constant 0 : index
    %148 = vector.load %arg6[%c6_167, %c2_168, %c0_169] : memref<9x16x16xbf16, #tpu.memory_space<vmem>>, vector<1x14x16xbf16>
    %149 = vector.shape_cast %148 : vector<1x14x16xbf16> to vector<14x16xbf16>
    %150 = tpu.concatenate %133, %135, %137, %139, %141, %143, %145, %147, %149 in 1 : vector<14x16xbf16>, vector<14x16xbf16>, vector<14x16xbf16>, vector<14x16xbf16>, vector<14x16xbf16>, vector<14x16xbf16>, vector<14x16xbf16>, vector<14x16xbf16>, vector<14x16xbf16> -> vector<14x144xbf16>
    %cst_170 = arith.constant dense<0.000000e+00> : vector<14x32xf32>
    %151 = tpu.matmul %150, %12, %cst_170 {dimension_numbers = #tpu.dot_dimension_numbers<[1], [0], [0], [1], [0, 0, 1, 1], [], []>} : vector<14x144xbf16>, vector<144x32xbf16>, vector<14x32xf32> -> vector<14x32xf32>
    %152 = arith.addf %151, %15 : vector<14x32xf32>
    %cst_171 = arith.constant 0.000000e+00 : f32
    %153 = vector.broadcast %cst_171 : f32 to vector<14x32xf32>
    %154 = arith.cmpf oge, %152, %153 : vector<14x32xf32>
    %cst_172 = arith.constant 0.00999999977 : f32
    %155 = vector.broadcast %cst_172 : f32 to vector<14x32xf32>
    %156 = arith.mulf %155, %152 : vector<14x32xf32>
    %157 = arith.select %154, %152, %156 : vector<14x32xi1>, vector<14x32xf32>
    %c0_173 = arith.constant 0 : index
    %c4_174 = arith.constant 4 : index
    %c0_175 = arith.constant 0 : index
    %c0_176 = arith.constant 0 : index
    %158 = vector.load %arg5[%c0_173, %c4_174, %c0_175, %c0_176] : memref<1x7x14x32xf32, #tpu.memory_space<vmem>>, vector<1x1x14x32xf32>
    %159 = vector.shape_cast %158 : vector<1x1x14x32xf32> to vector<14x32xf32>
    %160 = vector.shape_cast %157 : vector<14x32xf32> to vector<1x1x14x32xf32>
    tpu.vector_store %arg5[%c0_173, %c4_174, %c0_175, %c0_176], %160 {strides = array<i32>} : memref<1x7x14x32xf32, #tpu.memory_space<vmem>>, vector<1x1x14x32xf32>,
    %c5_177 = arith.constant 5 : index
    %c0_178 = arith.constant 0 : index
    %c0_179 = arith.constant 0 : index
    %161 = vector.load %arg6[%c5_177, %c0_178, %c0_179] : memref<9x16x16xbf16, #tpu.memory_space<vmem>>, vector<1x14x16xbf16>
    %162 = vector.shape_cast %161 : vector<1x14x16xbf16> to vector<14x16xbf16>
    %c5_180 = arith.constant 5 : index
    %c1_181 = arith.constant 1 : index
    %c0_182 = arith.constant 0 : index
    %163 = vector.load %arg6[%c5_180, %c1_181, %c0_182] : memref<9x16x16xbf16, #tpu.memory_space<vmem>>, vector<1x14x16xbf16>
    %164 = vector.shape_cast %163 : vector<1x14x16xbf16> to vector<14x16xbf16>
    %c5_183 = arith.constant 5 : index
    %c2_184 = arith.constant 2 : index
    %c0_185 = arith.constant 0 : index
    %165 = vector.load %arg6[%c5_183, %c2_184, %c0_185] : memref<9x16x16xbf16, #tpu.memory_space<vmem>>, vector<1x14x16xbf16>
    %166 = vector.shape_cast %165 : vector<1x14x16xbf16> to vector<14x16xbf16>
    %c6_186 = arith.constant 6 : index
    %c0_187 = arith.constant 0 : index
    %c0_188 = arith.constant 0 : index
    %167 = vector.load %arg6[%c6_186, %c0_187, %c0_188] : memref<9x16x16xbf16, #tpu.memory_space<vmem>>, vector<1x14x16xbf16>
    %168 = vector.shape_cast %167 : vector<1x14x16xbf16> to vector<14x16xbf16>
    %c6_189 = arith.constant 6 : index
    %c1_190 = arith.constant 1 : index
    %c0_191 = arith.constant 0 : index
    %169 = vector.load %arg6[%c6_189, %c1_190, %c0_191] : memref<9x16x16xbf16, #tpu.memory_space<vmem>>, vector<1x14x16xbf16>
    %170 = vector.shape_cast %169 : vector<1x14x16xbf16> to vector<14x16xbf16>
    %c6_192 = arith.constant 6 : index
    %c2_193 = arith.constant 2 : index
    %c0_194 = arith.constant 0 : index
    %171 = vector.load %arg6[%c6_192, %c2_193, %c0_194] : memref<9x16x16xbf16, #tpu.memory_space<vmem>>, vector<1x14x16xbf16>
    %172 = vector.shape_cast %171 : vector<1x14x16xbf16> to vector<14x16xbf16>
    %c7 = arith.constant 7 : index
    %c0_195 = arith.constant 0 : index
    %c0_196 = arith.constant 0 : index
    %173 = vector.load %arg6[%c7, %c0_195, %c0_196] : memref<9x16x16xbf16, #tpu.memory_space<vmem>>, vector<1x14x16xbf16>
    %174 = vector.shape_cast %173 : vector<1x14x16xbf16> to vector<14x16xbf16>
    %c7_197 = arith.constant 7 : index
    %c1_198 = arith.constant 1 : index
    %c0_199 = arith.constant 0 : index
    %175 = vector.load %arg6[%c7_197, %c1_198, %c0_199] : memref<9x16x16xbf16, #tpu.memory_space<vmem>>, vector<1x14x16xbf16>
    %176 = vector.shape_cast %175 : vector<1x14x16xbf16> to vector<14x16xbf16>
    %c7_200 = arith.constant 7 : index
    %c2_201 = arith.constant 2 : index
    %c0_202 = arith.constant 0 : index
    %177 = vector.load %arg6[%c7_200, %c2_201, %c0_202] : memref<9x16x16xbf16, #tpu.memory_space<vmem>>, vector<1x14x16xbf16>
    %178 = vector.shape_cast %177 : vector<1x14x16xbf16> to vector<14x16xbf16>
    %179 = tpu.concatenate %162, %164, %166, %168, %170, %172, %174, %176, %178 in 1 : vector<14x16xbf16>, vector<14x16xbf16>, vector<14x16xbf16>, vector<14x16xbf16>, vector<14x16xbf16>, vector<14x16xbf16>, vector<14x16xbf16>, vector<14x16xbf16>, vector<14x16xbf16> -> vector<14x144xbf16>
    %cst_203 = arith.constant dense<0.000000e+00> : vector<14x32xf32>
    %180 = tpu.matmul %179, %12, %cst_203 {dimension_numbers = #tpu.dot_dimension_numbers<[1], [0], [0], [1], [0, 0, 1, 1], [], []>} : vector<14x144xbf16>, vector<144x32xbf16>, vector<14x32xf32> -> vector<14x32xf32>
    %181 = arith.addf %180, %15 : vector<14x32xf32>
    %cst_204 = arith.constant 0.000000e+00 : f32
    %182 = vector.broadcast %cst_204 : f32 to vector<14x32xf32>
    %183 = arith.cmpf oge, %181, %182 : vector<14x32xf32>
    %cst_205 = arith.constant 0.00999999977 : f32
    %184 = vector.broadcast %cst_205 : f32 to vector<14x32xf32>
    %185 = arith.mulf %184, %181 : vector<14x32xf32>
    %186 = arith.select %183, %181, %185 : vector<14x32xi1>, vector<14x32xf32>
    %c0_206 = arith.constant 0 : index
    %c5_207 = arith.constant 5 : index
    %c0_208 = arith.constant 0 : index
    %c0_209 = arith.constant 0 : index
    %187 = vector.load %arg5[%c0_206, %c5_207, %c0_208, %c0_209] : memref<1x7x14x32xf32, #tpu.memory_space<vmem>>, vector<1x1x14x32xf32>
    %188 = vector.shape_cast %187 : vector<1x1x14x32xf32> to vector<14x32xf32>
    %189 = vector.shape_cast %186 : vector<14x32xf32> to vector<1x1x14x32xf32>
    tpu.vector_store %arg5[%c0_206, %c5_207, %c0_208, %c0_209], %189 {strides = array<i32>} : memref<1x7x14x32xf32, #tpu.memory_space<vmem>>, vector<1x1x14x32xf32>,
    %c6_210 = arith.constant 6 : index
    %c0_211 = arith.constant 0 : index
    %c0_212 = arith.constant 0 : index
    %190 = vector.load %arg6[%c6_210, %c0_211, %c0_212] : memref<9x16x16xbf16, #tpu.memory_space<vmem>>, vector<1x14x16xbf16>
    %191 = vector.shape_cast %190 : vector<1x14x16xbf16> to vector<14x16xbf16>
    %c6_213 = arith.constant 6 : index
    %c1_214 = arith.constant 1 : index
    %c0_215 = arith.constant 0 : index
    %192 = vector.load %arg6[%c6_213, %c1_214, %c0_215] : memref<9x16x16xbf16, #tpu.memory_space<vmem>>, vector<1x14x16xbf16>
    %193 = vector.shape_cast %192 : vector<1x14x16xbf16> to vector<14x16xbf16>
    %c6_216 = arith.constant 6 : index
    %c2_217 = arith.constant 2 : index
    %c0_218 = arith.constant 0 : index
    %194 = vector.load %arg6[%c6_216, %c2_217, %c0_218] : memref<9x16x16xbf16, #tpu.memory_space<vmem>>, vector<1x14x16xbf16>
    %195 = vector.shape_cast %194 : vector<1x14x16xbf16> to vector<14x16xbf16>
    %c7_219 = arith.constant 7 : index
    %c0_220 = arith.constant 0 : index
    %c0_221 = arith.constant 0 : index
    %196 = vector.load %arg6[%c7_219, %c0_220, %c0_221] : memref<9x16x16xbf16, #tpu.memory_space<vmem>>, vector<1x14x16xbf16>
    %197 = vector.shape_cast %196 : vector<1x14x16xbf16> to vector<14x16xbf16>
    %c7_222 = arith.constant 7 : index
    %c1_223 = arith.constant 1 : index
    %c0_224 = arith.constant 0 : index
    %198 = vector.load %arg6[%c7_222, %c1_223, %c0_224] : memref<9x16x16xbf16, #tpu.memory_space<vmem>>, vector<1x14x16xbf16>
    %199 = vector.shape_cast %198 : vector<1x14x16xbf16> to vector<14x16xbf16>
    %c7_225 = arith.constant 7 : index
    %c2_226 = arith.constant 2 : index
    %c0_227 = arith.constant 0 : index
    %200 = vector.load %arg6[%c7_225, %c2_226, %c0_227] : memref<9x16x16xbf16, #tpu.memory_space<vmem>>, vector<1x14x16xbf16>
    %201 = vector.shape_cast %200 : vector<1x14x16xbf16> to vector<14x16xbf16>
    %c8 = arith.constant 8 : index
    %c0_228 = arith.constant 0 : index
    %c0_229 = arith.constant 0 : index
    %202 = vector.load %arg6[%c8, %c0_228, %c0_229] : memref<9x16x16xbf16, #tpu.memory_space<vmem>>, vector<1x14x16xbf16>
    %203 = vector.shape_cast %202 : vector<1x14x16xbf16> to vector<14x16xbf16>
    %c8_230 = arith.constant 8 : index
    %c1_231 = arith.constant 1 : index
    %c0_232 = arith.constant 0 : index
    %204 = vector.load %arg6[%c8_230, %c1_231, %c0_232] : memref<9x16x16xbf16, #tpu.memory_space<vmem>>, vector<1x14x16xbf16>
    %205 = vector.shape_cast %204 : vector<1x14x16xbf16> to vector<14x16xbf16>
    %c8_233 = arith.constant 8 : index
    %c2_234 = arith.constant 2 : index
    %c0_235 = arith.constant 0 : index
    %206 = vector.load %arg6[%c8_233, %c2_234, %c0_235] : memref<9x16x16xbf16, #tpu.memory_space<vmem>>, vector<1x14x16xbf16>
    %207 = vector.shape_cast %206 : vector<1x14x16xbf16> to vector<14x16xbf16>
    %208 = tpu.concatenate %191, %193, %195, %197, %199, %201, %203, %205, %207 in 1 : vector<14x16xbf16>, vector<14x16xbf16>, vector<14x16xbf16>, vector<14x16xbf16>, vector<14x16xbf16>, vector<14x16xbf16>, vector<14x16xbf16>, vector<14x16xbf16>, vector<14x16xbf16> -> vector<14x144xbf16>
    %cst_236 = arith.constant dense<0.000000e+00> : vector<14x32xf32>
    %209 = tpu.matmul %208, %12, %cst_236 {dimension_numbers = #tpu.dot_dimension_numbers<[1], [0], [0], [1], [0, 0, 1, 1], [], []>} : vector<14x144xbf16>, vector<144x32xbf16>, vector<14x32xf32> -> vector<14x32xf32>
    %210 = arith.addf %209, %15 : vector<14x32xf32>
    %cst_237 = arith.constant 0.000000e+00 : f32
    %211 = vector.broadcast %cst_237 : f32 to vector<14x32xf32>
    %212 = arith.cmpf oge, %210, %211 : vector<14x32xf32>
    %cst_238 = arith.constant 0.00999999977 : f32
    %213 = vector.broadcast %cst_238 : f32 to vector<14x32xf32>
    %214 = arith.mulf %213, %210 : vector<14x32xf32>
    %215 = arith.select %212, %210, %214 : vector<14x32xi1>, vector<14x32xf32>
    %c0_239 = arith.constant 0 : index
    %c6_240 = arith.constant 6 : index
    %c0_241 = arith.constant 0 : index
    %c0_242 = arith.constant 0 : index
    %216 = vector.load %arg5[%c0_239, %c6_240, %c0_241, %c0_242] : memref<1x7x14x32xf32, #tpu.memory_space<vmem>>, vector<1x1x14x32xf32>
    %217 = vector.shape_cast %216 : vector<1x1x14x32xf32> to vector<14x32xf32>
    %218 = vector.shape_cast %215 : vector<14x32xf32> to vector<1x1x14x32xf32>
    tpu.vector_store %arg5[%c0_239, %c6_240, %c0_241, %c0_242], %218 {strides = array<i32>} : memref<1x7x14x32xf32, #tpu.memory_space<vmem>>, vector<1x1x14x32xf32>,
    return
  }
  func.func @transform_0(%arg0: i32, %arg1: i32) -> (i32, i32, i32, i32, i32) {
    %c0_i32 = arith.constant 0 : i32
    %c0_i32_0 = arith.constant 0 : i32
    %c0_i32_1 = arith.constant 0 : i32
    %c0_i32_2 = arith.constant 0 : i32
    %c0_i32_3 = arith.constant 0 : i32
    return %arg0, %c0_i32, %c0_i32_0, %c0_i32_1, %c0_i32_2 : i32, i32, i32, i32, i32
  }
  func.func @transform_1(%arg0: i32, %arg1: i32) -> (i32, i32) {
    %c0_i32 = arith.constant 0 : i32
    %c0_i32_0 = arith.constant 0 : i32
    %c0_i32_1 = arith.constant 0 : i32
    return %c0_i32, %c0_i32_0 : i32, i32
  }
  func.func @transform_2(%arg0: i32, %arg1: i32) -> (i32, i32) {
    %c0_i32 = arith.constant 0 : i32
    %c0_i32_0 = arith.constant 0 : i32
    %c0_i32_1 = arith.constant 0 : i32
    return %c0_i32, %c0_i32_0 : i32, i32
  }
  func.func @transform_3(%arg0: i32, %arg1: i32) -> (i32, i32, i32, i32) {
    %c0_i32 = arith.constant 0 : i32
    %c0_i32_0 = arith.constant 0 : i32
    %c0_i32_1 = arith.constant 0 : i32
    return %arg0, %arg1, %c0_i32, %c0_i32_0 : i32, i32, i32, i32
  }
}

</mosaic_0001>

<bundles_post_ra>
// kernel: tpu_custom_call.1
= control target key start
LH: loop header
LB: loop body
LE: loop exit
PB: predicated region body
PF: predicated region fallthrough
CT: control target
= control target key end

     0   :  { %s2562_s0 = inlined_call_operand.hbm [shape: bf16[6,16,2,16,32], index: 0, kind: input, shape index: {}]   ;;  %s2563_s1 = inlined_call_operand.vmem [shape: bf16[144,32], index: 1, kind: input, shape index: {}]   ;;  %s2564_s2 = inlined_call_operand.vmem [shape: f32[1,32], index: 2, kind: input, shape index: {}]   ;;  %s2565_s3 = inlined_call_operand.hbm [shape: f32[6,14,14,32], index: 3, kind: output, shape index: {}]  }
   0x1   :  { %2568 = sst [smem:[#allocation10_spill]] %s2562_s0 }
   0x2   :  { %8 = vsyncpa [#allocation4], 0 }
   0x3   :  { %10 = vsyncpa [#allocation4 + $0x1], 0 }
   0x4   :  { %11 = vsyncpa [#allocation5], 0 }
   0x5   :  { %13 = vsyncpa [#allocation5 + $0x1], 0  ;;  %s1858_s12 = smov 0   ;;  %s1860_s13 = smov 0  }
   0x6   :  { %s1862_s14 = smov 0   ;;  %s1864_s15 = smov 0  }
   0x7   :  { %s1866_s16 = smov 0   ;;  %s1868_s17 = smov 0  }
   0x8   :  { %s1870_s18 = smov 0   ;;  %s1872_s19 = smov 0  }
   0x9   :  { %s1874_s20 = smov 0   ;;  %s1876_s21 = smov 0  }
   0xa   :  { %s1878_s22 = smov 0  }
   0xb LB: > { %s1470_s23 = sadd.s32 4294967295, %s1822_s22   ;;  %s1471_s24 = sadd.s32 4294967294, %s1822_s22   ;;  %s1822_s22 = sphi %s1878_s22, %s19_s22   ;;  %s1818_s21 = sphi %s1876_s21, %s2589_s21   ;;  %s1814_s20 = sphi %s1874_s20, %s2588_s20   ;;  %s1810_s19 = sphi %s1872_s19, %s2587_s19   ;;  %s1806_s18 = sphi %s1870_s18, %s2586_s18   ;;  %s1802_s17 = sphi %s1868_s17, %s2585_s17   ;;  %s1798_s16 = sphi %s1866_s16, %s2584_s16   ;;  %s1794_s15 = sphi %s1864_s15, %s2583_s15   ;;  %s1790_s14 = sphi %s1862_s14, %s2582_s14   ;;  %s1786_s13 = sphi %s1860_s13, %s2581_s13   ;;  %s1782_s12 = sphi %s1858_s12, %s2580_s12  }
   0xc   : > { %s28_s25 = sadd.s32 1, %s1814_s20  ;;  %s31_s26 = sadd.s32 1, %s1818_s21 }
   0xd   : > { %p29_p0 = scmp.ge.s32.totalorder %s28_s25, 2  ;;  %s38_s27 = sadd.s32 1, %s1802_s17 }
   0xe   : > { %p45_p1 = scmp.ne.s32.totalorder %s1802_s17, %s1798_s16  ;;  %p46_p2 = scmp.eq.s32.totalorder %s1822_s22, 0 }
   0xf   : > { %s2591_s25 = smov (%p29_p0, %s28_s25), 0  ;;  %s2593_s26 = smov (!%p29_p0, %s31_s26), %s1818_s21 }
  0x10   : > { %p1922_p3 = por %p46_p2, %p45_p1  ;;  %p51_p4 = scmp.ne.s32.totalorder %s1798_s16, %s1794_s15 }
  0x11   : > { %p33_p5 = scmp.ge.s32.totalorder %s2593_s26, 6  ;;  %p52_p6 = scmp.eq.s32.totalorder %s1470_s23, 0 }
  0x12   : > { %s104_s29 = ssub.s32 %s1814_s20, %s2591_s25  ;;  %s108_s30 = sadd.s32 1, %s1790_s14 }
  0x13   : > { %s2595_s26 = smov (%p33_p5, %s2593_s26), 0  ;;  %p1932_p7 = por %p52_p6, %p51_p4 }
  0x14   : > { %2570 = sst [smem:[#allocation9_spill]] %s2595_s26  ;;  %p118_p8 = scmp.ne.s32.totalorder %s1790_s14, %s1786_s13 }
  0x15   : > { %s35_s5 = ssub.s32 %s1818_s21, %s2595_s26  ;;  %p119_p9 = scmp.eq.s32.totalorder %s1470_s23, 11 }
  0x16   : > { %p36_p10 = scmp.eq.s32.totalorder %s35_s5, 0  ;;  %s105_s6 = sor.u32 %s104_s29, %s35_s5 }
  0x17   : > { %p106_p11 = scmp.eq.s32.totalorder %s105_s6, 0  ;;  %p1940_p12 = por %p119_p9, %p118_p8 }
  0x18   : > { %s1945_s8 = scalar_select %p36_p10, %s1802_s17, %s38_s27  }
  0x19   : > { %s2572_s7 = scalar_select %p1940_p12, 1, 0 }
  0x1a   : > { %s1948_s9 = scalar_select %p106_p11, %s1790_s14, %s108_s30  }
  0x1b   : > { %p124_p13 = scmp.ne.s32.totalorder %s1786_s13, %s1782_s12  ;;  %p125_p0 = scmp.eq.s32.totalorder %s1471_s24, 11 }
  0x1c   : > { %p1559_p1 = scmp.lt.s32.totalorder %s1822_s22, 12  ;;  %s151_s11 = sand.u32 1, %s1802_s17  }
  0x1d   : > { %p1953_p2 = por %p125_p0, %p124_p13  ;;  %s1474_s15 = sshll.u32 %s151_s11, 8 }
  0x1e   : > { %s1542_s23 = sshll.u32 %s1818_s21, 12  ;;  %s2574_s0 = sld [smem:[#allocation10_spill]] }
  0x1f   : > { %s2573_s10 = scalar_select %p1953_p2, 1, 0 }
  0x20   : > { %s155_s27 = scalar_lea.vmem [#allocation3], %s1474_s15  ;;  %p1968_p4 = pnand %p1559_p1, %p1922_p3 }
  0x21   : > { %s162_s30 = sshll.u32 %s155_s27, 4  ;;  %s1973_s26 = scalar_lea.sflag [#allocation4], %s151_s11  ;;  %s1964_s30 = int_to_ptr.vmem [resolvable:$true] %s162_s30 }
  0x22   : > { %p1672_p8 = pneg %p1968_p4 }
  0x24   : > { %s1962_s6 = scalar_lea.hbm %s2574_s0, %s1542_s23  ;;  %s1675_s28 = scalar_lea.hbm %s2574_s0, 24576 }
  0x25   : > { %s1670_s23 = scalar_lea.hbm %s1962_s6, 4096  ;;  %p1676_p3 = scmp.lt.u32.totalorder %s1962_s6, %s2574_s0 }
  0x26   : > { %p1671_p6 = scmp.ne.s32.totalorder %s1962_s6, %s1670_s23  ;;  %p1677_p11 = scmp.lt.u32.totalorder %s1675_s28, %s1670_s23 }
  0x27   : > { %p1679_p0 = scmp.lt.u32.totalorder %s1670_s23, %s1962_s6 }
  0x28   : > { %p1673_p9 = pnand %p1672_p8, %p1671_p6  ;;  %p1678_p13 = por %p1677_p11, %p1676_p3 }
  0x2a   : > { %p1674_p10 = pneg %p1673_p9  ;;  %p1680_p1 = por %p1679_p0, %p1678_p13 }
  0x2c   : > { %p1681_p5 = pnand %p1680_p1, %p1674_p10 }
  0x2e   : > { %1684 = shalt.err (!%p1681_p5)
}
  0x2f   : > { %s1685_s11 = scalar_lea.vmem %s1964_s30, 4096  ;;  %s1824_s15 = smov [#allocation3]  }
  0x30   : > { %p1686_p6 = scmp.ne.s32.totalorder %s1964_s30, %s1685_s11  ;;  %s1690_s29 = sshll.u32 %s1824_s15, 4  ;;  %s1691_s29 = int_to_ptr.vmem [resolvable:$false] %s1690_s29 }
  0x31   : > { %s1692_s5 = scalar_lea.vmem %s1691_s29, 8192  ;;  %p1693_p12 = scmp.lt.s32.totalorder %s1964_s30, %s1691_s29 }
  0x32   : > { %p1688_p9 = pnand %p1686_p6, %p1672_p8  ;;  %p1694_p3 = scmp.lt.s32.totalorder %s1692_s5, %s1685_s11 }
  0x34   : > { %p1689_p2 = pneg %p1688_p9  ;;  %p1695_p11 = por %p1694_p3, %p1693_p12 }
  0x36   : > { %p1696_p13 = pnand %p1695_p11, %p1689_p2 }
  0x38   : > { %1699 = shalt.err (!%p1696_p13)
}
  0x39   : > { %s1825_s23 = smov 64   ;;  %s1826_s28 = smov 4  }
  0x3a   : > { %1554 = dma.hbm_to_vmem [thread:$0]  (!%p1968_p4), %s1962_s6, 4096, %s1964_s30, %s1973_s26, %s1825_s23, %s1825_s23, %s1826_s28  }
  0x3b   : > { %p170_p5 = scmp.lt.s32.totalorder %s1822_s22, 13  ;;  %p2576_p8 = scmp.ge.s32.totalorder %s1822_s22, 1 }
  0x3d   : > { %p171_p10 = pnand %p2576_p8, %p170_p5 }
  0x3e   : > { %s176_s27 = sand.u32 (!%p171_p10), 1, %s1798_s16  }
  0x3f   : > { %174 = sbr.rel (%p171_p10) target bundleno = 725 (0x2d5), region = 32  ;;  %s1478_s11 = sshll.u32 (!%p171_p10), %s176_s27, 8 }
  0x40   : > { %s177_s15 = scalar_lea.sflag (!%p171_p10), [#allocation4], %s176_s27  ;;  %s180_s29 = scalar_lea.vmem (!%p171_p10), [#allocation3], %s1478_s11 }
  0x46   : > { %1773 = dma.done.wait (%p1932_p7), %s177_s15, 4096  }
  0x47   : > { %1775 = vsyncadd (%p1932_p7), %s177_s15, 4294963200  ;;  %s1543_s5 = smul.u32 112, %s1806_s18  ;;  %s1827_s26 = smov 112   ;;  %v2099_v42 = vld [vmem:[%s2563_s1] sm:$0xff]   ;;  %v1828_v43 = vmov 0   ;;  %v2107_v44 = vld [vmem:[%s2563_s1 + $0x8] sm:$0xff]  }
  0x48   : > { %578 = vmatprep.subr.bf16.mxu0 %v1828_v43  ;;  %700 = vmatprep.subr.bf16.mxu1 %v1828_v43  ;;  %v2116_v45 = vld [vmem:[%s2563_s1 + $0x10] sm:$0xff]   ;;  %v2125_v46 = vld [vmem:[%s2563_s1 + $0x18] sm:$0xff]   ;;  %v2134_v47 = vld [vmem:[%s2563_s1 + $0x20] sm:$0xff]   ;;  %vm410_vm0 = vcmask 130048   ;;  %s1829_s11 = smov 48   ;;  %s1830_s15 = smov 32  }
  0x49   : > { %s2010_s0 = scalar_lea.vmem %s180_s29, %s1543_s5 [#allocation3]  ;;  %579 = vmatpush1.bf16.msra.mxu0 %v2099_v42  ;;  %701 = vmatpush1.bf16.msra.mxu1 %v2099_v42  ;;  %v2143_v48 = vld [vmem:[%s2563_s1 + $0x28] sm:$0xff]   ;;  %v2159_v57 = vld [vmem:[%s2563_s1 + $0x30] sm:$0xff]   ;;  %s1831_s29 = smov 64   ;;  %vm502_vm1 = vcmask 261120   ;;  %vm505_vm2 = vcmask 392192   ;;  %vm508_vm3 = vcmask 523264  }
  0x4a   : > { %v211_v0 = vld [vmem:[%s2010_s0 + $0x10] sm:$0xf]  ;;  %v1484_v1 = vld [vmem:[%s2010_s0 + $0x18] sm:$0xf]  ;;  %v209_v2 = vld [vmem:[%s2010_s0] sm:$0xf]  ;;  %580 = vmatprep.subr.bf16.mxu0 %v1828_v43  ;;  %702 = vmatprep.subr.bf16.mxu1 %v1828_v43 }
  0x4b   : > { %v2015_v3 = vmax.bf16 %v1484_v1, %v211_v0  ;;  %v1482_v4 = vld [vmem:[%s2010_s0 + $0x8] sm:$0xf]  ;;  %v212_v5 = vld [vmem:[%s2010_s0 + $0x14] sm:$0xf]  ;;  %v1485_v6 = vld [vmem:[%s2010_s0 + $0x1c] sm:$0xf] }
  0x4c   : > { %v2020_v7 = vmax.bf16 %v1482_v4, %v209_v2  ;;  %v210_v8 = vld [vmem:[%s2010_s0 + $0x4] sm:$0xf]  ;;  %v1483_v9 = vld [vmem:[%s2010_s0 + $0xc] sm:$0xf]  ;;  %v2026_v10 = vmax.bf16 %v1485_v6, %v212_v5  ;;  %v213_v14 = vld [vmem:[%s2010_s0 + $0x20] sm:$0xf] }
  0x4d   : > { %288 = vrot.lane.b32.xlu1 %v2015_v3, %s1827_s26  ;;  %v2030_v11 = vmax.bf16 %v1483_v9, %v210_v8  ;;  %v214_v12 = vld [vmem:[%s2010_s0 + $0x24] sm:$0xf]  ;;  %v1487_v13 = vld [vmem:[%s2010_s0 + $0x2c] sm:$0xf]  ;;  %v1486_v15 = vld [vmem:[%s2010_s0 + $0x28] sm:$0xf]  ;;  %581 = vmatpush1.bf16.msra.mxu0 %v2107_v44 }
  0x4e   : > { %284 = vrot.lane.b32.xlu0 %v2020_v7, %s1827_s26  ;;  %v2038_v16 = vmax.bf16 %v1487_v13, %v214_v12  ;;  %v2042_v17 = vmax.bf16 %v1486_v15, %v213_v14  ;;  %v216_v18 = vld [vmem:[%s2010_s0 + $0x34] sm:$0xf]  ;;  %v1489_v19 = vld [vmem:[%s2010_s0 + $0x3c] sm:$0xf]  ;;  %v215_v20 = vld [vmem:[%s2010_s0 + $0x30] sm:$0xf]  ;;  %703 = vmatpush1.bf16.msra.mxu1 %v2107_v44 }
  0x4f   : > { %v1488_v21 = vld [vmem:[%s2010_s0 + $0x38] sm:$0xf]  ;;  %v218_v22 = vld [vmem:[%s2010_s0 + $0x44] sm:$0xf]  ;;  %v1491_v23 = vld [vmem:[%s2010_s0 + $0x4c] sm:$0xf]  ;;  %v2052_v24 = vmax.bf16 %v1489_v19, %v216_v18  ;;  %582 = vmatprep.subr.bf16.mxu0 %v1828_v43  ;;  %704 = vmatprep.subr.bf16.mxu1 %v1828_v43 }
  0x50   : > { %v2056_v25 = vmax.bf16 %v1488_v21, %v215_v20  ;;  %v217_v26 = vld [vmem:[%s2010_s0 + $0x40] sm:$0xf]  ;;  %v1490_v27 = vld [vmem:[%s2010_s0 + $0x48] sm:$0xf]  ;;  %v220_v28 = vld [vmem:[%s2010_s0 + $0x54] sm:$0xf]  ;;  %v2063_v29 = vmax.bf16 %v1491_v23, %v218_v22 }
  0x51   : > { %290 = vrot.lane.b32.xlu1 %v2026_v10, %s1827_s26  ;;  %v2067_v30 = vmax.bf16 %v1490_v27, %v217_v26  ;;  %v1493_v31 = vld [vmem:[%s2010_s0 + $0x5c] sm:$0xf]  ;;  %v219_v32 = vld [vmem:[%s2010_s0 + $0x50] sm:$0xf]  ;;  %v1492_v33 = vld [vmem:[%s2010_s0 + $0x58] sm:$0xf]  ;;  %583 = vmatpush1.bf16.msra.mxu0 %v2116_v45 }
  0x52   : > { %286 = vrot.lane.b32.xlu0 %v2030_v11, %s1827_s26  ;;  %v2074_v34 = vmax.bf16 %v1493_v31, %v220_v28  ;;  %v2078_v35 = vmax.bf16 %v1492_v33, %v219_v32  ;;  %v222_v36 = vld [vmem:[%s2010_s0 + $0x64] sm:$0xf]  ;;  %v1495_v37 = vld [vmem:[%s2010_s0 + $0x6c] sm:$0xf]  ;;  %v221_v38 = vld [vmem:[%s2010_s0 + $0x60] sm:$0xf]  ;;  %705 = vmatpush1.bf16.msra.mxu1 %v2116_v45 }
  0x53   : > { %v1494_v39 = vld [vmem:[%s2010_s0 + $0x68] sm:$0xf]  ;;  %v2086_v40 = vmax.bf16 %v1495_v37, %v222_v36  ;;  %584 = vmatprep.subr.bf16.mxu0 %v1828_v43  ;;  %706 = vmatprep.subr.bf16.mxu1 %v1828_v43  ;;  %v2172_v2 = vld [vmem:[%s2563_s1 + $0x38] sm:$0xff]   ;;  %v2183_v6 = vld [vmem:[%s2563_s1 + $0x40] sm:$0xff]   ;;  %s1832_s5 = smov 16   ;;  %s1833_s4 = smov 80  }
  0x54   : > { %v2090_v41 = vmax.bf16 %v1494_v39, %v221_v38  ;;  %v1496_v38 = vld [vmem:[%s2010_s0 + $0x78] sm:$0xf]  ;;  %s1834_s6 = smov 96   ;;  %vm511_vm4 = vcmask 654336   ;;  %vm514_vm5 = vcmask 785408   ;;  %vm517_vm6 = vcmask 916480  }
  0x55   : > { %294 = vrot.lane.b32.xlu1 %v2038_v16, %s1827_s26  ;;  %585 = vmatpush1.bf16.msra.mxu0 %v2125_v46  ;;  %vm626_vm9 = vcmask 259072   ;;  %s1544_s28 = smul.u32 14, %s1806_s18  ;;  %p2577_p12 = scmp.ne.s32.totalorder %s2572_s7, 0 }
  0x56   : > { %292 = vrot.lane.b32.xlu0 %v2042_v17, %s1827_s26  ;;  %707 = vmatpush1.bf16.msra.mxu1 %v2125_v46  ;;  %s1546_s27 = smul.u32 28, %s1810_s19 }
  0x57   : > { %586 = vmatprep.subr.bf16.mxu0 %v1828_v43  ;;  %708 = vmatprep.subr.bf16.mxu1 %v1828_v43 }
  0x59   : > { %298 = vrot.lane.b32.xlu1 %v2052_v24, %s1827_s26  ;;  %587 = vmatpush1.bf16.msra.mxu0 %v2134_v47 }
  0x5a   : > { %296 = vrot.lane.b32.xlu0 %v2056_v25, %s1827_s26  ;;  %709 = vmatpush1.bf16.msra.mxu1 %v2134_v47 }
  0x5b   : > { %588 = vmatprep.subr.bf16.mxu0 %v1828_v43  ;;  %710 = vmatprep.subr.bf16.mxu1 %v1828_v43 }
  0x5d   : > { %302 = vrot.lane.b32.xlu1 %v2063_v29, %s1827_s26  ;;  %589 = vmatpush1.bf16.msra.mxu0 %v2143_v48 }
  0x5e   : > { %300 = vrot.lane.b32.xlu0 %v2067_v30, %s1827_s26  ;;  %711 = vmatpush1.bf16.msra.mxu1 %v2143_v48 }
  0x5f   : > { %590 = vmatprep.subr.bf16.mxu0 %v1828_v43  ;;  %712 = vmatprep.subr.bf16.mxu1 %v1828_v43 }
  0x61   : > { %306 = vrot.lane.b32.xlu1 %v2074_v34, %s1827_s26  ;;  %591 = vmatpush1.bf16.msra.mxu0 %v2159_v57 }
  0x62   : > { %304 = vrot.lane.b32.xlu0 %v2078_v35, %s1827_s26  ;;  %713 = vmatpush1.bf16.msra.mxu1 %v2159_v57 }
  0x63   : > { %592 = vmatprep.subr.bf16.mxu0 %v1828_v43  ;;  %714 = vmatprep.subr.bf16.mxu1 %v1828_v43 }
  0x65   : > { %310 = vrot.lane.b32.xlu1 %v2086_v40, %s1827_s26  ;;  %593 = vmatpush1.bf16.msra.mxu0 %v2172_v2 }
  0x66   : > { %308 = vrot.lane.b32.xlu0 %v2090_v41, %s1827_s26  ;;  %715 = vmatpush1.bf16.msra.mxu1 %v2172_v2 }
  0x67   : > { %594 = vmatprep.subr.bf16.mxu0 %v1828_v43  ;;  %716 = vmatprep.subr.bf16.mxu1 %v1828_v43 }
  0x69   : > { %595 = vmatpush1.bf16.msra.mxu0 %v2183_v6 }
  0x6a   : > { %717 = vmatpush1.bf16.msra.mxu1 %v2183_v6  ;;  %822 = vmatprep.subr.bf16.mxu0 %v1828_v43 }
  0x6b   : > { %944 = vmatprep.subr.bf16.mxu1 %v1828_v43 }
  0xbf   : > { %v289_v49 = vpop.permute.xlu1 %288 }
  0xc0   : > { %v285_v50 = vpop.permute.xlu0 %284  ;;  %v340_v52 = vmax.bf16 %v289_v49, %v2015_v3 }
  0xc1   : > { %v338_v55 = vmax.bf16 %v285_v50, %v2020_v7 }
  0xc3   : > { %v291_v51 = vpop.permute.xlu1 %290 }
  0xc4   : > { %v341_v53 = vmax.bf16 %v291_v51, %v2026_v10  ;;  %v287_v54 = vpop.permute.xlu0 %286 }
  0xc5   : > { %v339_v56 = vmax.bf16 %v287_v54, %v2030_v11 }
  0xc6   : > { %v1501_v58 = vcombine.low %v340_v52, %v341_v53 }
  0xc7   : > { %v1500_v59 = vcombine.low %v338_v55, %v339_v56  ;;  %v295_v60 = vpop.permute.xlu1 %294 }
  0xc8   : > { %412 = vst.msk [vmem:[#allocation2 + $0x8] sm:$0xff] %vm410_vm0, %v1501_v58  ;;  %v343_v61 = vmax.bf16 %v295_v60, %v2038_v16  ;;  %v293_v62 = vpop.permute.xlu0 %292  ;;  %v224_v58 = vld [vmem:[%s2010_s0 + $0x74] sm:$0xf]  ;;  %v1497_v60 = vld [vmem:[%s2010_s0 + $0x7c] sm:$0xf] }
  0xc9   : > { %411 = vst.msk [vmem:[#allocation2] sm:$0xff] %vm410_vm0, %v1500_v59  ;;  %v342_v63 = vmax.bf16 %v293_v62, %v2042_v17 }
  0xcb   : > { %v1502_v0 = vcombine.low %v342_v63, %v343_v61  ;;  %v299_v1 = vpop.permute.xlu1 %298  ;;  %v225_v61 = vld [vmem:[%s2010_s0 + $0x80] sm:$0xf]  ;;  %v2222_v63 = vmax.bf16 %v1497_v60, %v224_v58 }
  0xcc   : > { %v345_v3 = vmax.bf16 %v299_v1, %v2052_v24  ;;  %v297_v4 = vpop.permute.xlu0 %296  ;;  %v226_v1 = vld [vmem:[%s2010_s0 + $0x84] sm:$0xf] }
  0xcd   : > { %413 = vst.msk [vmem:[#allocation2 + $0x10] sm:$0xff] %vm410_vm0, %v1502_v0  ;;  %v344_v5 = vmax.bf16 %v297_v4, %v2056_v25 }
  0xcf   : > { %v449_v7 = vld [vmem:[#allocation2 + $0x8] sm:$0x7f]  ;;  %v1503_v9 = vcombine.low %v344_v5, %v345_v3  ;;  %v303_v10 = vpop.permute.xlu1 %302 }
  0xd0   : > { %v450_v8 = vld [vmem:[#allocation2 + $0x8] sm:$0xff]  ;;  %470 = vrot.lane.b32.xlu0 %v449_v7, %s1829_s11  ;;  %v447_v11 = vld [vmem:[#allocation2] sm:$0xfe]  ;;  %v347_v14 = vmax.bf16 %v303_v10, %v2063_v29  ;;  %v301_v15 = vpop.permute.xlu0 %300 }
  0xd1   : > { %v475_v12 = vshll.u32 %v450_v8, 16  ;;  %v446_v13 = vld [vmem:[#allocation2] sm:$0xff]  ;;  %v466_v16 = vrot.slane %v447_v11, 1  ;;  %414 = vst.msk [vmem:[#allocation2 + $0x18] sm:$0xff] %vm410_vm0, %v1503_v9  ;;  %v346_v18 = vmax.bf16 %v301_v15, %v2067_v30  ;;  %v473_v19 = vshrl.u32 %v450_v8, 16 }
  0xd2   : > { %v459_v17 = vshll.u32 %v446_v13, 16  ;;  %v457_v21 = vshrl.u32 %v446_v13, 16  ;;  %v451_v33 = vld [vmem:[#allocation2 + $0x8] sm:$0xfe] }
  0xd3   : > { %v477_v20 = vrot.slane %v475_v12, 1  ;;  %467 = vrot.lane.b32.xlu1 %v466_v16, %s1830_s15  ;;  %v1504_v23 = vcombine.low %v346_v18, %v347_v14  ;;  %v307_v24 = vpop.permute.xlu1 %306  ;;  %v482_v51 = vrot.slane %v451_v33, 1  ;;  %v1499_v3 = vld [vmem:[%s2010_s0 + $0x8c] sm:$0xf] }
  0xd4   : > { %v461_v22 = vrot.slane %v459_v17, 1  ;;  %v455_v26 = vld [vmem:[#allocation2 + $0x10] sm:$0xfe]  ;;  %v349_v28 = vmax.bf16 %v307_v24, %v2074_v34  ;;  %v305_v29 = vpop.permute.xlu0 %304  ;;  %v630_v4 = vld [vmem:[#allocation2 + $0x8] sm:$0xfe]  ;;  %v2232_v5 = vmax.bf16 %v1499_v3, %v226_v1 }
  0xd5   : > { %v2195_v25 = vor.u32 %v477_v20, %v473_v19  ;;  %v454_v27 = vld [vmem:[#allocation2 + $0x10] sm:$0xff]  ;;  %v498_v31 = vrot.slane %v455_v26, 1  ;;  %415 = vst.msk [vmem:[#allocation2 + $0x20] sm:$0xff] %vm410_vm0, %v1504_v23  ;;  %v348_v36 = vmax.bf16 %v305_v29, %v2078_v35  ;;  %v648_v7 = vrot.slane %v630_v4, 1 }
  0xd6   : > { %v462_v30 = vor.u32 %v461_v22, %v457_v21  ;;  %v491_v32 = vshll.u32 %v454_v27, 16  ;;  %v223_v34 = vld [vmem:[%s2010_s0 + $0x70] sm:$0xf]  ;;  %v489_v35 = vshrl.u32 %v454_v27, 16 }
  0xd7   : > { %479 = vrot.lane.b32.xlu1 %v2195_v25, %s1831_s29  ;;  %v311_v37 = vpop.permute.xlu1 %310  ;;  %1519 = vmatprep.mubr.msk.bf16.mxu0 %vm410_vm0, %v498_v31  ;;  %v1505_v39 = vcombine.low %v348_v36, %v349_v28  ;;  %v453_v55 = vld [vmem:[#allocation2 + $0x10] sm:$0x7f] }
  0xd8   : > { %463 = vrot.lane.b32.xlu0 %v462_v30, %s1832_s5  ;;  %v351_v49 = vmax.bf16 %v311_v37, %v2086_v40  ;;  %v309_v50 = vpop.permute.xlu0 %308  ;;  %v493_v52 = vrot.slane %v491_v32, 1  ;;  %v637_v54 = vld [vmem:[#allocation2 + $0x18] sm:$0xfe]  ;;  %v2211_v40 = vmax.bf16 %v1496_v38, %v223_v34  ;;  %v752_v8 = vld [vmem:[#allocation2 + $0x10] sm:$0xfe] }
  0xd9   : > { %v350_v53 = vmax.bf16 %v309_v50, %v2090_v41  ;;  %416 = vst.msk [vmem:[#allocation2 + $0x28] sm:$0xff] %vm410_vm0, %v1505_v39  ;;  %v680_v56 = vrot.slane %v637_v54, 1  ;;  %v1498_v41 = vld [vmem:[%s2010_s0 + $0x88] sm:$0xf]  ;;  %v770_v9 = vrot.slane %v752_v8, 1  ;;  %v636_v17 = vld [vmem:[#allocation2 + $0x18] sm:$0xff] }
  0xda   : > { %v494_v62 = vor.u32 %v493_v52, %v489_v35  ;;  %v2224_v0 = vmax.bf16 %v1498_v41, %v225_v61  ;;  %v631_v10 = vld [vmem:[#allocation2 + $0x10] sm:$0x7f]  ;;  %v753_v12 = vld [vmem:[#allocation2 + $0x18] sm:$0x7f]  ;;  %v673_v18 = vshll.u32 %v636_v17, 16  ;;  %v671_v21 = vshrl.u32 %v636_v17, 16 }
  0xdb   : > { %486 = vrot.lane.b32.xlu1 %v453_v55, %s1834_s6  ;;  %v1506_v59 = vcombine.low %v350_v53, %v351_v49  ;;  %1520 = vmatprep.mubr.msk.bf16.mxu1 %vm410_vm0, %v680_v56  ;;  %v633_v11 = vld [vmem:[#allocation2 + $0x10] sm:$0xfe]  ;;  %v755_v13 = vld [vmem:[#allocation2 + $0x18] sm:$0xfe]  ;;  %s200_s0 = sand.u32 1, %s1786_s13  }
  0xdc   : > { %483 = vrot.lane.b32.xlu0 %v482_v51, %s1833_s4  ;;  %v664_v14 = vrot.slane %v633_v11, 1  ;;  %v786_v15 = vrot.slane %v755_v13, 1  ;;  %v635_v16 = vld [vmem:[#allocation2 + $0x18] sm:$0x7f]  ;;  %v757_v19 = vld [vmem:[#allocation2 + $0x20] sm:$0x7f] }
  0xdd   : > { %417 = vst.msk [vmem:[#allocation2 + $0x30] sm:$0xff] %vm410_vm0, %v1506_v59  ;;  %v758_v20 = vld [vmem:[#allocation2 + $0x20] sm:$0xff]  ;;  %v675_v22 = vrot.slane %v673_v18, 1  ;;  %v874_v28 = vld [vmem:[#allocation2 + $0x18] sm:$0xfe]  ;;  %s1545_s24 = smul.u32 112, %s200_s0 }
  0xde   : > { %v795_v23 = vshll.u32 %v758_v20, 16  ;;  %v793_v26 = vshrl.u32 %v758_v20, 16  ;;  %v892_v29 = vrot.slane %v874_v28, 1  ;;  %v875_v32 = vld [vmem:[#allocation2 + $0x20] sm:$0x7f] }
  0xdf   : > { %312 = vrot.lane.b32.xlu1 %v2211_v40, %s1827_s26  ;;  %v676_v24 = vor.u32 %v675_v22, %v671_v21  ;;  %v877_v33 = vld [vmem:[#allocation2 + $0x20] sm:$0xfe]  ;;  %s2447_s23 = scalar_lea.vmem [#allocation6], %s1545_s24 }
  0xe0   : > { %495 = vrot.lane.b32.xlu0 %v494_v62, %s1827_s26  ;;  %v797_v27 = vrot.slane %v795_v23, 1  ;;  %v908_v36 = vrot.slane %v877_v33, 1  ;;  %v997_v37 = vld [vmem:[#allocation2 + $0x28] sm:$0x7f] }
  0xe1   : > { %v999_v34 = vld [vmem:[#allocation2 + $0x28] sm:$0xfe] }
  0xe2   : > { %v798_v30 = vor.u32 %v797_v27, %v793_v26  ;;  %v1030_v38 = vrot.slane %v999_v34, 1  ;;  %v879_v39 = vld [vmem:[#allocation2 + $0x28] sm:$0x7f] }
  0xe3   : > { %316 = vrot.lane.b32.xlu1 %v2224_v0, %s1827_s26  ;;  %v880_v49 = vld [vmem:[#allocation2 + $0x28] sm:$0xff] }
  0xe4   : > { %314 = vrot.lane.b32.xlu0 %v2222_v63, %s1827_s26  ;;  %v917_v50 = vshll.u32 %v880_v49, 16  ;;  %v1001_v51 = vld [vmem:[#allocation2 + $0x30] sm:$0x7f]  ;;  %v915_v52 = vshrl.u32 %v880_v49, 16  ;;  %v1118_v59 = vld [vmem:[#allocation2 + $0x28] sm:$0xfe] }
  0xe5   : > { %v1002_v35 = vld [vmem:[#allocation2 + $0x30] sm:$0xff]  ;;  %v1136_v61 = vrot.slane %v1118_v59, 1 }
  0xe6   : > { %v919_v53 = vrot.slane %v917_v50, 1  ;;  %v1039_v54 = vshll.u32 %v1002_v35, 16  ;;  %v1037_v56 = vshrl.u32 %v1002_v35, 16  ;;  %v1240_v41 = vld [vmem:[#allocation2 + $0x30] sm:$0xfe] }
  0xe7   : > { %649 = vrot.lane.b32.xlu1 %v648_v7, %s1830_s15  ;;  %v1119_v1 = vld [vmem:[#allocation2 + $0x30] sm:$0x7f] }
  0xe8   : > { %318 = vrot.lane.b32.xlu0 %v2232_v5, %s1827_s26  ;;  %v2262_v55 = vor.u32 %v919_v53, %v915_v52  ;;  %v1041_v58 = vrot.slane %v1039_v54, 1  ;;  %v1121_v3 = vld [vmem:[#allocation2 + $0x30] sm:$0xfe]  ;;  %v628_v54 = vld [vmem:[#allocation2 + $0x8] sm:$0x7f] }
  0xe9   : > { %v1152_v4 = vrot.slane %v1121_v3, 1 }
  0xea   : > { %v2268_v60 = vor.u32 %v1041_v58, %v1037_v56 }
  0xeb   : > { %652 = vrot.lane.b32.xlu1 %v631_v10, %s1829_s11  ;;  %v445_v10 = vld [vmem:[#allocation2] sm:$0x7f] }
  0xec   : > { %771 = vrot.lane.b32.xlu0 %v770_v9, %s1830_s15 }
  0xef   : > { %665 = vrot.lane.b32.xlu1 %v664_v14, %s1833_s4 }
  0xf0   : > { %774 = vrot.lane.b32.xlu0 %v753_v12, %s1829_s11 }
  0xf3   : > { %668 = vrot.lane.b32.xlu1 %v635_v16, %s1834_s6 }
  0xf4   : > { %787 = vrot.lane.b32.xlu0 %v786_v15, %s1833_s4 }
  0xf7   : > { %645 = vrot.lane.b32.xlu1 %v2195_v25, %s1832_s5  ;;  %v996_v25 = vld [vmem:[#allocation2 + $0x20] sm:$0xfe] }
  0xf8   : > { %790 = vrot.lane.b32.xlu0 %v757_v19, %s1834_s6  ;;  %v1014_v31 = vrot.slane %v996_v25, 1  ;;  %v759_v19 = vld [vmem:[#allocation2 + $0x20] sm:$0xfe] }
  0xfb   : > { %661 = vrot.lane.b32.xlu1 %v494_v62, %s1831_s29 }
  0xfc   : > { %767 = vrot.lane.b32.xlu0 %v494_v62, %s1832_s5  ;;  %v1258_v62 = vrot.slane %v1240_v41, 1 }
  0xff   : > { %677 = vrot.lane.b32.xlu1 %v676_v24, %s1827_s26 }
 0x100   : > { %783 = vrot.lane.b32.xlu0 %v676_v24, %s1831_s29 }
 0x103   : > { %893 = vrot.lane.b32.xlu1 %v892_v29, %s1830_s15 }
 0x104   : > { %799 = vrot.lane.b32.xlu0 %v798_v30, %s1827_s26 }
 0x107   : > { %896 = vrot.lane.b32.xlu1 %v875_v32, %s1829_s11 }
 0x108   : > { %1015 = vrot.lane.b32.xlu0 %v1014_v31, %s1830_s15 }
 0x10b   : > { %909 = vrot.lane.b32.xlu1 %v908_v36, %s1833_s4 }
 0x10c   : > { %1018 = vrot.lane.b32.xlu0 %v997_v37, %s1829_s11 }
 0x10f   : > { %912 = vrot.lane.b32.xlu1 %v879_v39, %s1834_s6 }
 0x110   : > { %1031 = vrot.lane.b32.xlu0 %v1030_v38, %s1833_s4 }
 0x113   : > { %889 = vrot.lane.b32.xlu1 %v676_v24, %s1832_s5  ;;  %v802_v24 = vrot.slane %v759_v19, 1 }
 0x114   : > { %1034 = vrot.lane.b32.xlu0 %v1001_v51, %s1834_s6 }
 0x117   : > { %905 = vrot.lane.b32.xlu1 %v798_v30, %s1831_s29 }
 0x118   : > { %1011 = vrot.lane.b32.xlu0 %v798_v30, %s1832_s5 }
 0x11b   : > { %921 = vrot.lane.b32.xlu1 %v2262_v55, %s1827_s26 }
 0x11c   : > { %1027 = vrot.lane.b32.xlu0 %v2262_v55, %s1831_s29 }
 0x11f   : > { %1137 = vrot.lane.b32.xlu1 %v1136_v61, %s1830_s15 }
 0x120   : > { %1043 = vrot.lane.b32.xlu0 %v2268_v60, %s1827_s26 }
 0x123   : > { %1140 = vrot.lane.b32.xlu1 %v1119_v1, %s1829_s11 }
 0x124   : > { %1259 = vrot.lane.b32.xlu0 %v1258_v62, %s1830_s15  ;;  %s1377_s15 = sshll.u32 %s2447_s23, 4  ;;  %s2488_s15 = int_to_ptr.vmem [resolvable:$true] %s1377_s15 }
 0x127   : > { %1153 = vrot.lane.b32.xlu1 %v1152_v4, %s1833_s4 }
 0x142   : > { %v471_v7 = vpop.permute.xlu0 %470 }
 0x145   : > { %v468_v8 = vpop.permute.xlu1 %467 }
 0x149   : > { %v480_v9 = vpop.permute.xlu1 %479 }
 0x14a   : > { %v464_v11 = vpop.permute.xlu0 %463 }
 0x14b   : > { %v501_v12 = vsel %vm410_vm0, %v445_v10, %v464_v11 }
 0x14c   : > { %v504_v13 = vsel %vm502_vm1, %v501_v12, %v468_v8 }
 0x14d   : > { %v507_v14 = vsel %vm505_vm2, %v504_v13, %v471_v7  ;;  %v487_v15 = vpop.permute.xlu1 %486  ;;  %v750_v7 = vld [vmem:[#allocation2 + $0x10] sm:$0x7f] }
 0x14e   : > { %v510_v16 = vsel %vm508_vm3, %v507_v14, %v480_v9  ;;  %v484_v17 = vpop.permute.xlu0 %483 }
 0x14f   : > { %v513_v18 = vsel %vm511_vm4, %v510_v16, %v484_v17 }
 0x150   : > { %v516_v22 = vsel %vm514_vm5, %v513_v18, %v487_v15  ;;  %v881_v15 = vld [vmem:[#allocation2 + $0x28] sm:$0xfe] }
 0x151   : > { %v313_v20 = vpop.permute.xlu1 %312 }
 0x152   : > { %v496_v21 = vpop.permute.xlu0 %495  ;;  %v352_v26 = vmax.bf16 %v313_v20, %v2211_v40 }
 0x153   : > { %v519_v23 = vsel %vm517_vm6, %v516_v22, %v496_v21  ;;  %v924_v22 = vrot.slane %v881_v15, 1 }
 0x154   : > { %611 = vmatmul.mubr.bf16.vlgmr.msra.gmra.mrb[0].mxu0 %v519_v23 }
 0x155   : > { %823 = vmatpush1.bf16.msra.mxu0 %v2099_v42  ;;  %1523 = vmatprep.mubr.msk.bf16.mxu0 %vm410_vm0, %v802_v24  ;;  %v317_v27 = vpop.permute.xlu1 %316 }
 0x156   : > { %v315_v28 = vpop.permute.xlu0 %314  ;;  %824 = vmatprep.subr.bf16.mxu0 %v1828_v43  ;;  %v354_v30 = vmax.bf16 %v317_v27, %v2224_v0 }
 0x157   : > { %v353_v29 = vmax.bf16 %v315_v28, %v2222_v63 }
 0x159   : > { %v1507_v25 = vcombine.low %v352_v26, %v353_v29  ;;  %825 = vmatpush1.bf16.msra.mxu0 %v2107_v44  ;;  %v650_v31 = vpop.permute.xlu1 %649  ;;  %v1003_v26 = vld [vmem:[#allocation2 + $0x30] sm:$0xfe] }
 0x15a   : > { %v319_v32 = vpop.permute.xlu0 %318  ;;  %826 = vmatprep.subr.bf16.mxu0 %v1828_v43 }
 0x15b   : > { %418 = vst.msk [vmem:[#allocation2 + $0x38] sm:$0xff] %vm410_vm0, %v1507_v25  ;;  %v355_v40 = vmax.bf16 %v319_v32, %v2232_v5 }
 0x15d   : > { %v1508_v33 = vcombine.low %v354_v30, %v355_v40  ;;  %827 = vmatpush1.bf16.msra.mxu0 %v2116_v45  ;;  %v653_v36 = vpop.permute.xlu1 %652  ;;  %v1046_v30 = vrot.slane %v1003_v26, 1 }
 0x15e   : > { %v772_v37 = vpop.permute.xlu0 %771  ;;  %828 = vmatprep.subr.bf16.mxu0 %v1828_v43 }
 0x15f   : > { %419 = vst.msk [vmem:[#allocation2 + $0x40] sm:$0xff] %vm410_vm0, %v1508_v33 }
 0x161   : > { %829 = vmatpush1.bf16.msra.mxu0 %v2125_v46  ;;  %v666_v63 = vpop.permute.xlu1 %665 }
 0x162   : > { %v775_v0 = vpop.permute.xlu0 %774  ;;  %830 = vmatprep.subr.bf16.mxu0 %v1828_v43  ;;  %v1241_v34 = vld [vmem:[#allocation2 + $0x38] sm:$0x7f] }
 0x163   : > { %v1123_v38 = vld [vmem:[#allocation2 + $0x38] sm:$0x7f]  ;;  %1262 = vrot.lane.b32.xlu0 %v1241_v34, %s1829_s11  ;;  %s1374_s11 = sadd.s32 %s1546_s27, %s1544_s28 }
 0x164   : > { %v1243_v39 = vld [vmem:[#allocation2 + $0x38] sm:$0xfe]  ;;  %1156 = vrot.lane.b32.xlu1 %v1123_v38, %s1834_s6  ;;  %s1539_s18 = sshll.u32 %s1374_s11, 7 }
 0x165   : > { %v1124_v5 = vld [vmem:[#allocation2 + $0x38] sm:$0xff]  ;;  %831 = vmatpush1.bf16.msra.mxu0 %v2134_v47  ;;  %v1274_v49 = vrot.slane %v1243_v39, 1  ;;  %v669_v51 = vpop.permute.xlu1 %668  ;;  %v994_v39 = vld [vmem:[#allocation2 + $0x20] sm:$0x7f] }
 0x166   : > { %v1161_v50 = vshll.u32 %v1124_v5, 16  ;;  %v788_v35 = vpop.permute.xlu0 %787  ;;  %832 = vmatprep.subr.bf16.mxu0 %v1828_v43  ;;  %v1245_v52 = vld [vmem:[#allocation2 + $0x40] sm:$0x7f]  ;;  %v1159_v41 = vshrl.u32 %v1124_v5, 16 }
 0x167   : > { %1275 = vrot.lane.b32.xlu0 %v1274_v49, %s1833_s4  ;;  %v1246_v59 = vld [vmem:[#allocation2 + $0x40] sm:$0xff]  ;;  %s2501_s4 = scalar_lea.sflag [#allocation5], %s200_s0 }
 0x168   : > { %1133 = vrot.lane.b32.xlu1 %v2262_v55, %s1832_s5  ;;  %v1163_v53 = vrot.slane %v1161_v50, 1  ;;  %v1283_v3 = vshll.u32 %v1246_v59, 16  ;;  %v1281_v16 = vshrl.u32 %v1246_v59, 16 }
 0x169   : > { %833 = vmatpush1.bf16.msra.mxu0 %v2143_v48  ;;  %v646_v56 = vpop.permute.xlu1 %645 }
 0x16a   : > { %v791_v58 = vpop.permute.xlu0 %790  ;;  %834 = vmatprep.subr.bf16.mxu0 %v1828_v43  ;;  %v683_v61 = vsel %vm410_vm0, %v628_v54, %v646_v56  ;;  %v1164_v1 = vor.u32 %v1163_v53, %v1159_v41  ;;  %v1285_v17 = vrot.slane %v1283_v3, 1  ;;  %v1125_v41 = vld [vmem:[#allocation2 + $0x38] sm:$0xfe] }
 0x16b   : > { %1278 = vrot.lane.b32.xlu0 %v1245_v52, %s1834_s6  ;;  %v685_v55 = vsel %vm502_vm1, %v683_v61, %v650_v31  ;;  %s1700_s6 = scalar_lea.vmem %s2488_s15, 1792 }
 0x16c   : > { %1149 = vrot.lane.b32.xlu1 %v2268_v60, %s1831_s29  ;;  %v687_v62 = vsel %vm505_vm2, %v685_v55, %v653_v36  ;;  %v1286_v24 = vor.u32 %v1285_v17, %v1281_v16  ;;  %p1701_p7 = scmp.ne.s32.totalorder %s2488_s15, %s1700_s6 }
 0x16d   : > { %835 = vmatpush1.bf16.msra.mxu0 %v2159_v57  ;;  %v662_v4 = vpop.permute.xlu1 %661 }
 0x16e   : > { %v768_v8 = vpop.permute.xlu0 %767  ;;  %836 = vmatprep.subr.bf16.mxu0 %v1828_v43  ;;  %v689_v9 = vsel %vm508_vm3, %v687_v62, %v662_v4  ;;  %p1702_p2 = pnand %p1701_p7, %p2577_p12 }
 0x16f   : > { %v805_v10 = vsel %vm410_vm0, %v750_v7, %v768_v8  ;;  %1255 = vrot.lane.b32.xlu0 %v2268_v60, %s1832_s5  ;;  %v691_v11 = vsel %vm511_vm4, %v689_v9, %v666_v63  ;;  %v1247_v7 = vld [vmem:[#allocation2 + $0x40] sm:$0xfe]  ;;  %s2495_s5 = scalar_lea.hbm %s2565_s3, %s1539_s18 }
 0x170   : > { %1165 = vrot.lane.b32.xlu1 %v1164_v1, %s1827_s26  ;;  %v807_v12 = vsel %vm502_vm1, %v805_v10, %v772_v37  ;;  %v693_v14 = vsel %vm514_vm5, %v691_v11, %v669_v51  ;;  %v872_v37 = vld [vmem:[#allocation2 + $0x18] sm:$0x7f]  ;;  %v1290_v9 = vrot.slane %v1247_v7, 1  ;;  %p1703_p4 = pneg %p1702_p2 }
 0x171   : > { %837 = vmatpush1.bf16.msra.mxu0 %v2172_v2  ;;  %v809_v13 = vsel %vm505_vm2, %v807_v12, %v775_v0  ;;  %v678_v18 = vpop.permute.xlu1 %677 }
 0x172   : > { %v784_v19 = vpop.permute.xlu0 %783  ;;  %838 = vmatprep.subr.bf16.mxu0 %v1828_v43  ;;  %v695_v60 = vsel %vm517_vm6, %v693_v14, %v678_v18  ;;  %v1238_v18 = vld [vmem:[#allocation2 + $0x30] sm:$0x7f] }
 0x173   : > { %v811_v20 = vsel %vm508_vm3, %v809_v13, %v784_v19  ;;  %1271 = vrot.lane.b32.xlu0 %v1164_v1, %s1831_s29  ;;  %733 = vmatmul.mubr.bf16.vlgmr.msra.gmra.mrb[0].mxu1 %v695_v60  ;;  %v1168_v1 = vrot.slane %v1125_v41, 1 }
 0x174   : > { %v813_v21 = vsel %vm511_vm4, %v811_v20, %v788_v35  ;;  %945 = vmatpush1.bf16.msra.mxu1 %v2099_v42  ;;  %1526 = vmatprep.mubr.msk.bf16.mxu1 %vm410_vm0, %v924_v22 }
 0x175   : > { %839 = vmatpush1.bf16.msra.mxu0 %v2183_v6  ;;  %v815_v23 = vsel %vm514_vm5, %v813_v21, %v791_v58  ;;  %v894_v27 = vpop.permute.xlu1 %893  ;;  %946 = vmatprep.subr.bf16.mxu1 %v1828_v43 }
 0x176   : > { %v800_v28 = vpop.permute.xlu0 %799  ;;  %1066 = vmatprep.subr.bf16.mxu0 %v1828_v43 }
 0x177   : > { %v817_v29 = vsel %vm517_vm6, %v815_v23, %v800_v28  ;;  %1287 = vrot.lane.b32.xlu0 %v1286_v24, %s1827_s26  ;;  %s1835_s26 = smov [#allocation6]  }
 0x178   : > { %855 = vmatmul.mubr.bf16.vlgmr.msra.gmra.mrb[4].mxu0 %v817_v29  ;;  %947 = vmatpush1.bf16.msra.mxu1 %v2107_v44  ;;  %s1704_s30 = sshll.u32 %s1835_s26, 4  ;;  %s1705_s30 = int_to_ptr.vmem [resolvable:$false] %s1704_s30 }
 0x179   : > { %1067 = vmatpush1.bf16.msra.mxu0 %v2099_v42  ;;  %1529 = vmatprep.mubr.msk.bf16.mxu0 %vm410_vm0, %v1046_v30  ;;  %v897_v25 = vpop.permute.xlu1 %896  ;;  %v2441_v30 = vld [vmem:[%s2564_s2] ss:$0 sm:$0xff]  ;;  %s1706_s24 = scalar_lea.vmem %s1705_s30, 3584  ;;  %p1707_p0 = scmp.lt.s32.totalorder %s2488_s15, %s1705_s30 }
 0x17a   : > { %v1016_v31 = vpop.permute.xlu0 %1015  ;;  %948 = vmatprep.subr.bf16.mxu1 %v1828_v43  ;;  %1068 = vmatprep.subr.bf16.mxu0 %v1828_v43  ;;  %p1708_p1 = scmp.lt.s32.totalorder %s1706_s24, %s1700_s6 }
 0x17c   : > { %949 = vmatpush1.bf16.msra.mxu1 %v2116_v45  ;;  %p1709_p6 = por %p1708_p1, %p1707_p0 }
 0x17d   : > { %1069 = vmatpush1.bf16.msra.mxu0 %v2107_v44  ;;  %v910_v32 = vpop.permute.xlu1 %909  ;;  %950 = vmatprep.subr.bf16.mxu1 %v1828_v43 }
 0x17e   : > { %v1019_v40 = vpop.permute.xlu0 %1018  ;;  %1070 = vmatprep.subr.bf16.mxu0 %v1828_v43  ;;  %p1710_p9 = pnand %p1709_p6, %p1703_p4 }
 0x180   : > { %951 = vmatpush1.bf16.msra.mxu1 %v2125_v46 }
 0x181   : > { %1071 = vmatpush1.bf16.msra.mxu0 %v2116_v45  ;;  %v913_v33 = vpop.permute.xlu1 %912  ;;  %952 = vmatprep.subr.bf16.mxu1 %v1828_v43 }
 0x182   : > { %v1032_v36 = vpop.permute.xlu0 %1031  ;;  %1072 = vmatprep.subr.bf16.mxu0 %v1828_v43 }
 0x184   : > { %953 = vmatpush1.bf16.msra.mxu1 %v2134_v47 }
 0x185   : > { %1073 = vmatpush1.bf16.msra.mxu0 %v2125_v46  ;;  %v890_v63 = vpop.permute.xlu1 %889  ;;  %954 = vmatprep.subr.bf16.mxu1 %v1828_v43 }
 0x186   : > { %v1035_v0 = vpop.permute.xlu0 %1034  ;;  %1074 = vmatprep.subr.bf16.mxu0 %v1828_v43  ;;  %v927_v34 = vsel %vm410_vm0, %v872_v37, %v890_v63 }
 0x187   : > { %v929_v38 = vsel %vm502_vm1, %v927_v34, %v894_v27 }
 0x188   : > { %955 = vmatpush1.bf16.msra.mxu1 %v2143_v48  ;;  %v931_v49 = vsel %vm505_vm2, %v929_v38, %v897_v25 }
 0x189   : > { %1075 = vmatpush1.bf16.msra.mxu0 %v2134_v47  ;;  %956 = vmatprep.subr.bf16.mxu1 %v1828_v43  ;;  %v906_v50 = vpop.permute.xlu1 %905 }
 0x18a   : > { %v1012_v5 = vpop.permute.xlu0 %1011  ;;  %1076 = vmatprep.subr.bf16.mxu0 %v1828_v43  ;;  %v933_v52 = vsel %vm508_vm3, %v931_v49, %v906_v50 }
 0x18b   : > { %v1049_v51 = vsel %vm410_vm0, %v994_v39, %v1012_v5  ;;  %v935_v56 = vsel %vm511_vm4, %v933_v52, %v910_v32 }
 0x18c   : > { %v1051_v35 = vsel %vm502_vm1, %v1049_v51, %v1016_v31  ;;  %957 = vmatpush1.bf16.msra.mxu1 %v2159_v57  ;;  %v937_v59 = vsel %vm514_vm5, %v935_v56, %v913_v33 }
 0x18d   : > { %1077 = vmatpush1.bf16.msra.mxu0 %v2143_v48  ;;  %958 = vmatprep.subr.bf16.mxu1 %v1828_v43  ;;  %v1053_v53 = vsel %vm505_vm2, %v1051_v35, %v1019_v40  ;;  %v922_v61 = vpop.permute.xlu1 %921 }
 0x18e   : > { %1078 = vmatprep.subr.bf16.mxu0 %v1828_v43  ;;  %v1028_v54 = vpop.permute.xlu0 %1027  ;;  %v939_v62 = vsel %vm517_vm6, %v937_v59, %v922_v61 }
 0x18f   : > { %v1055_v58 = vsel %vm508_vm3, %v1053_v53, %v1028_v54 }
 0x190   : > { %959 = vmatpush1.bf16.msra.mxu1 %v2172_v2  ;;  %v1057_v55 = vsel %vm511_vm4, %v1055_v58, %v1032_v36 }
 0x191   : > { %1079 = vmatpush1.bf16.msra.mxu0 %v2159_v57  ;;  %960 = vmatprep.subr.bf16.mxu1 %v1828_v43  ;;  %v1059_v3 = vsel %vm514_vm5, %v1057_v55, %v1035_v0 }
 0x192   : > { %1080 = vmatprep.subr.bf16.mxu0 %v1828_v43  ;;  %v1044_v4 = vpop.permute.xlu0 %1043 }
 0x193   : > { %v1061_v8 = vsel %vm517_vm6, %v1059_v3, %v1044_v4 }
 0x194   : > { %961 = vmatpush1.bf16.msra.mxu1 %v2183_v6 }
 0x195   : > { %1081 = vmatpush1.bf16.msra.mxu0 %v2172_v2  ;;  %1188 = vmatprep.subr.bf16.mxu1 %v1828_v43 }
 0x196   : > { %1082 = vmatprep.subr.bf16.mxu0 %v1828_v43 }
 0x197   : > { %977 = vmatmul.mubr.bf16.vlgmr.msra.gmra.mrb[4].mxu1 %v939_v62 }
 0x198   : > { %1532 = vmatprep.mubr.msk.bf16.mxu1 %vm410_vm0, %v1168_v1  ;;  %1189 = vmatpush1.bf16.msra.mxu1 %v2099_v42 }
 0x199   : > { %1083 = vmatpush1.bf16.msra.mxu0 %v2183_v6  ;;  %1190 = vmatprep.subr.bf16.mxu1 %v1828_v43 }
 0x19a   : > { %1310 = vmatprep.subr.bf16.mxu0 %v1828_v43 }
 0x19c   : > { %1099 = vmatmul.mubr.bf16.vlgmr.msra.gmra.mrb[8].mxu0 %v1061_v8  ;;  %1191 = vmatpush1.bf16.msra.mxu1 %v2107_v44 }
 0x19d   : > { %1535 = vmatprep.mubr.msk.bf16.mxu0 %vm410_vm0, %v1290_v9  ;;  %1311 = vmatpush1.bf16.msra.mxu0 %v2099_v42  ;;  %v1138_v42 = vpop.permute.xlu1 %1137 }
 0x19e   : > { %1312 = vmatprep.subr.bf16.mxu0 %v1828_v43  ;;  %1192 = vmatprep.subr.bf16.mxu1 %v1828_v43 }
 0x1a0   : > { %1193 = vmatpush1.bf16.msra.mxu1 %v2116_v45 }
 0x1a1   : > { %1313 = vmatpush1.bf16.msra.mxu0 %v2107_v44  ;;  %1194 = vmatprep.subr.bf16.mxu1 %v1828_v43  ;;  %v1141_v44 = vpop.permute.xlu1 %1140 }
 0x1a2   : > { %1314 = vmatprep.subr.bf16.mxu0 %v1828_v43 }
 0x1a4   : > { %1195 = vmatpush1.bf16.msra.mxu1 %v2125_v46 }
 0x1a5   : > { %1315 = vmatpush1.bf16.msra.mxu0 %v2116_v45  ;;  %1196 = vmatprep.subr.bf16.mxu1 %v1828_v43  ;;  %v1154_v45 = vpop.permute.xlu1 %1153 }
 0x1a6   : > { %1316 = vmatprep.subr.bf16.mxu0 %v1828_v43 }
 0x1a8   : > { %1197 = vmatpush1.bf16.msra.mxu1 %v2134_v47 }
 0x1a9   : > { %1317 = vmatpush1.bf16.msra.mxu0 %v2125_v46  ;;  %1198 = vmatprep.subr.bf16.mxu1 %v1828_v43  ;;  %v1260_v46 = vpop.permute.xlu0 %1259 }
 0x1aa   : > { %1318 = vmatprep.subr.bf16.mxu0 %v1828_v43 }
 0x1ac   : > { %1199 = vmatpush1.bf16.msra.mxu1 %v2143_v48 }
 0x1ad   : > { %1319 = vmatpush1.bf16.msra.mxu0 %v2134_v47  ;;  %1200 = vmatprep.subr.bf16.mxu1 %v1828_v43 }
 0x1ae   : > { %1320 = vmatprep.subr.bf16.mxu0 %v1828_v43 }
 0x1b0   : > { %1201 = vmatpush1.bf16.msra.mxu1 %v2159_v57 }
 0x1b1   : > { %1321 = vmatpush1.bf16.msra.mxu0 %v2143_v48  ;;  %1202 = vmatprep.subr.bf16.mxu1 %v1828_v43 }
 0x1b2   : > { %1322 = vmatprep.subr.bf16.mxu0 %v1828_v43 }
 0x1b4   : > { %1203 = vmatpush1.bf16.msra.mxu1 %v2172_v2 }
 0x1b5   : > { %1323 = vmatpush1.bf16.msra.mxu0 %v2159_v57  ;;  %1204 = vmatprep.subr.bf16.mxu1 %v1828_v43  ;;  %v1116_v57 = vld [vmem:[#allocation2 + $0x28] sm:$0x7f] }
 0x1b6   : > { %1324 = vmatprep.subr.bf16.mxu0 %v1828_v43 }
 0x1b8   : > { %1205 = vmatpush1.bf16.msra.mxu1 %v2183_v6 }
 0x1b9   : > { %1325 = vmatpush1.bf16.msra.mxu0 %v2172_v2 }
 0x1ba   : > { %1326 = vmatprep.subr.bf16.mxu0 %v1828_v43 }
 0x1bd   : > { %1327 = vmatpush1.bf16.msra.mxu0 %v2183_v6 }
 0x1d5   : > { %v1263_v48 = vpop.permute.xlu0 %1262 }
 0x1d6   : > { %v1157_v47 = vpop.permute.xlu1 %1156 }
 0x1d9   : > { %v1276_v11 = vpop.permute.xlu0 %1275 }
 0x1da   : > { %v1134_v10 = vpop.permute.xlu1 %1133 }
 0x1db   : > { %v1171_v12 = vsel %vm410_vm0, %v1116_v57, %v1134_v10 }
 0x1dc   : > { %v1173_v13 = vsel %vm502_vm1, %v1171_v12, %v1138_v42 }
 0x1dd   : > { %v1175_v2 = vsel %vm505_vm2, %v1173_v13, %v1141_v44  ;;  %v1279_v15 = vpop.permute.xlu0 %1278 }
 0x1de   : > { %v1150_v14 = vpop.permute.xlu1 %1149 }
 0x1df   : > { %v1177_v43 = vsel %vm508_vm3, %v1175_v2, %v1150_v14 }
 0x1e0   : > { %v1179_v6 = vsel %vm511_vm4, %v1177_v43, %v1154_v45 }
 0x1e1   : > { %v1181_v16 = vsel %vm514_vm5, %v1179_v6, %v1157_v47  ;;  %v1256_v19 = vpop.permute.xlu0 %1255 }
 0x1e2   : > { %v1166_v17 = vpop.permute.xlu1 %1165  ;;  %v1293_v60 = vsel %vm410_vm0, %v1238_v18, %v1256_v19 }
 0x1e3   : > { %v1183_v20 = vsel %vm517_vm6, %v1181_v16, %v1166_v17  ;;  %v1295_v21 = vsel %vm502_vm1, %v1293_v60, %v1260_v46 }
 0x1e4   : > { %1221 = vmatmul.mubr.bf16.vlgmr.msra.gmra.mrb[8].mxu1 %v1183_v20  ;;  %v1297_v22 = vsel %vm505_vm2, %v1295_v21, %v1263_v48 }
 0x1e5   : > { %v1272_v23 = vpop.permute.xlu0 %1271 }
 0x1e6   : > { %v1299_v24 = vsel %vm508_vm3, %v1297_v22, %v1272_v23 }
 0x1e7   : > { %v1301_v26 = vsel %vm511_vm4, %v1299_v24, %v1276_v11 }
 0x1e8   : > { %v1303_v27 = vsel %vm514_vm5, %v1301_v26, %v1279_v15 }
 0x1e9   : > { %v1288_v28 = vpop.permute.xlu0 %1287 }
 0x1ea   : > { %v1305_v29 = vsel %vm517_vm6, %v1303_v27, %v1288_v28 }
 0x1eb   : > { %1343 = vmatmul.mubr.bf16.vlgmr.msra.gmra.mrb[12].mxu0 %v1305_v29 }
 0x227   : > { %v612_v25 = vpop.f32.mrb[0].mxu0 }
 0x228   : > { %v613_v31 = vadd.f32 %v2441_v30, %v612_v25  ;;  %v614_v32 = vpop.f32.mrb[1].mxu0 }
 0x229   : > { %v615_v40 = vpop.f32.mrb[2].mxu0 }
 0x22a   : > { %vm619_vm7 = vcmp.ge.f32.partialorder %v613_v31, 0.0  ;;  %v621_v33 = vmul.f32 0.01, %v613_v31  ;;  %v616_v36 = vadd.f32 %v2441_v30, %v615_v40  ;;  %v617_v37 = vpop.f32.mrb[3].mxu0 }
 0x22c   : > { %v623_v63 = vsel %vm619_vm7, %v613_v31, %v621_v33  ;;  %vm620_vm8 = vcmp.ge.f32.partialorder %v616_v36, 0.0  ;;  %v622_v0 = vmul.f32 0.01, %v616_v36 }
 0x22d   : > { %625 = vst.msk [vmem:[%s2447_s23] sm:$0xff] %vm502_vm1, %v623_v63 }
 0x22e   : > { %v624_v34 = vsel %vm620_vm8, %v616_v36, %v622_v0 }
 0x22f   : > { %627 = vst.msk [vmem:[%s2447_s23 + $0x8] sm:$0x3f] %vm626_vm9, %v624_v34 }
 0x246   : > { %v734_v38 = vpop.f32.mrb[0].mxu1 }
 0x247   : > { %v735_v39 = vadd.f32 %v2441_v30, %v734_v38  ;;  %v736_v5 = vpop.f32.mrb[1].mxu1 }
 0x248   : > { %v737_v49 = vpop.f32.mrb[2].mxu1 }
 0x249   : > { %vm741_vm10 = vcmp.ge.f32.partialorder %v735_v39, 0.0  ;;  %v743_v50 = vmul.f32 0.01, %v735_v39  ;;  %v738_v51 = vadd.f32 %v2441_v30, %v737_v49  ;;  %v739_v35 = vpop.f32.mrb[3].mxu1 }
 0x24b   : > { %v856_v52 = vpop.f32.mrb[4].mxu0  ;;  %v745_v53 = vsel %vm741_vm10, %v735_v39, %v743_v50  ;;  %vm742_vm11 = vcmp.ge.f32.partialorder %v738_v51, 0.0  ;;  %v744_v54 = vmul.f32 0.01, %v738_v51 }
 0x24c   : > { %v857_v56 = vadd.f32 %v2441_v30, %v856_v52  ;;  %v858_v58 = vpop.f32.mrb[5].mxu0  ;;  %1521 = vst.msk [vmem:[%s2447_s23 + $0x10] sm:$0xff] %vm502_vm1, %v745_v53 }
 0x24d   : > { %v859_v59 = vpop.f32.mrb[6].mxu0  ;;  %v746_v61 = vsel %vm742_vm11, %v738_v51, %v744_v54 }
 0x24e   : > { %vm863_vm12 = vcmp.ge.f32.partialorder %v857_v56, 0.0  ;;  %v865_v41 = vmul.f32 0.01, %v857_v56  ;;  %v860_v55 = vadd.f32 %v2441_v30, %v859_v59  ;;  %v861_v62 = vpop.f32.mrb[7].mxu0  ;;  %1522 = vst.msk [vmem:[%s2447_s23 + $0x18] sm:$0x3f] %vm626_vm9, %v746_v61 }
 0x250   : > { %v867_v1 = vsel %vm863_vm12, %v857_v56, %v865_v41  ;;  %vm864_vm13 = vcmp.ge.f32.partialorder %v860_v55, 0.0  ;;  %v866_v3 = vmul.f32 0.01, %v860_v55 }
 0x251   : > { %1524 = vst.msk [vmem:[%s2447_s23 + $0x20] sm:$0xff] %vm502_vm1, %v867_v1 }
 0x252   : > { %v868_v4 = vsel %vm864_vm13, %v860_v55, %v866_v3 }
 0x253   : > { %1525 = vst.msk [vmem:[%s2447_s23 + $0x28] sm:$0x3f] %vm626_vm9, %v868_v4 }
 0x26a   : > { %v978_v7 = vpop.f32.mrb[4].mxu1 }
 0x26b   : > { %v979_v8 = vadd.f32 %v2441_v30, %v978_v7  ;;  %v980_v9 = vpop.f32.mrb[5].mxu1 }
 0x26c   : > { %v981_v42 = vpop.f32.mrb[6].mxu1 }
 0x26d   : > { %vm985_vm14 = vcmp.ge.f32.partialorder %v979_v8, 0.0  ;;  %v987_v44 = vmul.f32 0.01, %v979_v8  ;;  %v982_v45 = vadd.f32 %v2441_v30, %v981_v42  ;;  %v983_v46 = vpop.f32.mrb[7].mxu1 }
 0x26f   : > { %v1100_v47 = vpop.f32.mrb[8].mxu0  ;;  %v989_v48 = vsel %vm985_vm14, %v979_v8, %v987_v44  ;;  %vm986_vm15 = vcmp.ge.f32.partialorder %v982_v45, 0.0  ;;  %v988_v57 = vmul.f32 0.01, %v982_v45 }
 0x270   : > { %v1101_v10 = vadd.f32 %v2441_v30, %v1100_v47  ;;  %v1102_v11 = vpop.f32.mrb[9].mxu0  ;;  %1527 = vst.msk [vmem:[%s2447_s23 + $0x30] sm:$0xff] %vm502_vm1, %v989_v48 }
 0x271   : > { %v1103_v12 = vpop.f32.mrb[10].mxu0  ;;  %v990_v13 = vsel %vm986_vm15, %v982_v45, %v988_v57 }
 0x272   : > { %vm1107_vm0 = vcmp.ge.f32.partialorder %v1101_v10, 0.0  ;;  %v1109_v2 = vmul.f32 0.01, %v1101_v10  ;;  %v1104_v14 = vadd.f32 %v2441_v30, %v1103_v12  ;;  %v1105_v15 = vpop.f32.mrb[11].mxu0  ;;  %1528 = vst.msk [vmem:[%s2447_s23 + $0x38] sm:$0x3f] %vm626_vm9, %v990_v13 }
 0x274   : > { %v1111_v43 = vsel %vm1107_vm0, %v1101_v10, %v1109_v2  ;;  %vm1108_vm2 = vcmp.ge.f32.partialorder %v1104_v14, 0.0  ;;  %v1110_v6 = vmul.f32 0.01, %v1104_v14 }
 0x275   : > { %1530 = vst.msk [vmem:[%s2447_s23 + $0x40] sm:$0xff] %vm502_vm1, %v1111_v43 }
 0x276   : > { %v1112_v16 = vsel %vm1108_vm2, %v1104_v14, %v1110_v6 }
 0x277   : > { %1531 = vst.msk [vmem:[%s2447_s23 + $0x48] sm:$0x3f] %vm626_vm9, %v1112_v16 }
 0x2b7   : > { %v1222_v17 = vpop.f32.mrb[8].mxu1 }
 0x2b8   : > { %v1223_v18 = vadd.f32 %v2441_v30, %v1222_v17  ;;  %v1224_v19 = vpop.f32.mrb[9].mxu1 }
 0x2b9   : > { %v1225_v20 = vpop.f32.mrb[10].mxu1 }
 0x2ba   : > { %vm1229_vm3 = vcmp.ge.f32.partialorder %v1223_v18, 0.0  ;;  %v1231_v60 = vmul.f32 0.01, %v1223_v18  ;;  %v1226_v21 = vadd.f32 %v2441_v30, %v1225_v20  ;;  %v1227_v22 = vpop.f32.mrb[11].mxu1 }
 0x2bc   : > { %v1233_v23 = vsel %vm1229_vm3, %v1223_v18, %v1231_v60  ;;  %vm1230_vm4 = vcmp.ge.f32.partialorder %v1226_v21, 0.0  ;;  %v1232_v24 = vmul.f32 0.01, %v1226_v21 }
 0x2bd   : > { %1533 = vst.msk [vmem:[%s2447_s23 + $0x50] sm:$0xff] %vm502_vm1, %v1233_v23 }
 0x2be   : > { %v1234_v26 = vsel %vm1230_vm4, %v1226_v21, %v1232_v24  ;;  %v1344_v27 = vpop.f32.mrb[12].mxu0 }
 0x2bf   : > { %1534 = vst.msk [vmem:[%s2447_s23 + $0x58] sm:$0x3f] %vm626_vm9, %v1234_v26  ;;  %v1345_v28 = vadd.f32 %v2441_v30, %v1344_v27  ;;  %v1346_v29 = vpop.f32.mrb[13].mxu0 }
 0x2c0   : > { %v1347_v25 = vpop.f32.mrb[14].mxu0 }
 0x2c1   : > { %vm1351_vm5 = vcmp.ge.f32.partialorder %v1345_v28, 0.0  ;;  %v1353_v31 = vmul.f32 0.01, %v1345_v28  ;;  %v1348_v32 = vadd.f32 %v2441_v30, %v1347_v25  ;;  %v1349_v40 = vpop.f32.mrb[15].mxu0 }
 0x2c3   : > { %v1355_v33 = vsel %vm1351_vm5, %v1345_v28, %v1353_v31  ;;  %vm1352_vm6 = vcmp.ge.f32.partialorder %v1348_v32, 0.0  ;;  %v1354_v36 = vmul.f32 0.01, %v1348_v32 }
 0x2c4   : > { %1536 = vst.msk [vmem:[%s2447_s23 + $0x60] sm:$0xff] %vm502_vm1, %v1355_v33 }
 0x2c5   : > { %v1356_v37 = vsel %vm1352_vm6, %v1348_v32, %v1354_v36 }
 0x2c6   : > { %1537 = vst.msk [vmem:[%s2447_s23 + $0x68] sm:$0x3f] %vm626_vm9, %v1356_v37 }
 0x2c7   : > { %1713 = shalt.err (!%p1710_p9)
}
 0x2c8   : > { %s1714_s0 = scalar_lea.hbm %s2495_s5, 1792  ;;  %s1718_s27 = scalar_lea.hbm %s2565_s3, 21504 }
 0x2c9   : > { %p1715_p3 = scmp.ne.s32.totalorder %s2495_s5, %s1714_s0  ;;  %p1719_p5 = scmp.lt.u32.totalorder %s2495_s5, %s2565_s3 }
 0x2ca   : > { %p1720_p8 = scmp.lt.u32.totalorder %s1718_s27, %s1714_s0  ;;  %p1722_p7 = scmp.lt.u32.totalorder %s1714_s0, %s2495_s5 }
 0x2cb   : > { %p1716_p11 = pnand %p1715_p3, %p2577_p12 }
 0x2cc   : > { %p1721_p10 = por %p1720_p8, %p1719_p5 }
 0x2cd   : > { %p1717_p13 = pneg %p1716_p11 }
 0x2ce   : > { %p1723_p2 = por %p1722_p7, %p1721_p10 }
 0x2d0   : > { %p1724_p4 = pnand %p1723_p2, %p1717_p13 }
 0x2d2   : > { %1727 = shalt.err (!%p1724_p4)
}
 0x2d3   : > { %s1836_s19 = smov 128   ;;  %s1837_s29 = smov 8  }
 0x2d4   : > { %1549 = dma.vmem_to_hbm [thread:$0]  (%p2577_p12), %s2488_s15, 1792, %s2495_s5, %s2501_s4, %s1836_s19, %s1836_s19, %s1837_s29  }
 0x2d5 PF: > { %p1560_p0 = scmp.ge.s32.totalorder %s1822_s22, 2  ;;  %s1392_s6 = sand.u32 1, %s1782_s12  }
 0x2d6   : > { %p2578_p1 = scmp.ne.s32.totalorder %s2573_s10, 0  ;;  %s1393_s26 = scalar_lea.sflag [#allocation5], %s1392_s6 }
 0x2d8   : > { %p1556_p6 = pnand %p1560_p0, %p2578_p1 }
 0x2da   : > { %1777 = dma.done.wait (!%p1556_p6), %s1393_s26, 1792  }
 0x2db   : > { %1779 = vsyncadd (!%p1556_p6), %s1393_s26, 4294965504  ;;  %s19_s22 = sadd.s32 1, %s1822_s22   ;;  %s2579_s7 = sld [smem:[#allocation9_spill]] }
 0x2dc   : > { %p16_p9 = scmp.ge.s32.totalorder %s19_s22, 14   ;;  %s2580_s12 = smov %s1786_s13 }
 0x2dd   : > { %s2581_s13 = smov %s1790_s14  ;;  %s2582_s14 = smov %s1948_s9 }
 0x2de   : > { %s2583_s15 = smov %s1798_s16  ;;  %s2584_s16 = smov %s1802_s17 }
 0x2df   : > { %s2585_s17 = smov %s1945_s8  ;;  %s2586_s18 = smov %s1814_s20 }
 0x2e0   : > { %s2587_s19 = smov %s1818_s21  ;;  %s2588_s20 = smov %s2591_s25 }
 0x2e1   : > { %s2589_s21 = smov %s2579_s7  ;;  %18 = sbr.rel (!%p16_p9) target bundleno = 11 (0xb), region = 93 }
 0x2e8   :  { %1398 = vsyncpa [#allocation4], 1 }
 0x2e9   :  { %1400 = vsyncpa [#allocation4 + $0x1], 1 }
 0x2ea   :  { %1401 = vsyncpa [#allocation5], 1 }
 0x2eb   :  { %1403 = vsyncpa [#allocation5 + $0x1], 1 }

</bundles_post_ra>
